<compile_context>
chip_gen: v6e
topology: v6e:2x2x1
jax: 0.10.0
libtpu: 0.0.40
codegen_flags: <defaults>
</compile_context>

<pallas_src>
import functools
import math

import jax
import jax.numpy as jnp
import numpy as np
from jax import lax
from jax.experimental import pallas as pl
from jax.experimental.pallas import tpu as pltpu


# Synthetic irreps description: list of (mul, ir_dim, is_scalar).
# Equivalent to o3.Irreps("8x0e + 4x1o"): 8 scalars + 4 vectors -> dim = 8 + 12 = 20.
IRREPS = ((8, 1, True), (4, 3, False))
EPS = 1e-5

_VMEM_BLOCK_BUDGET = 8 * 1024 * 1024      # in+out double-buffered block budget
_VMEM_LIMIT_BYTES = 32 * 1024 * 1024      # explicit scoped-VMEM limit (safe on v5e/v6e/v7x)


def _irreps_dim(irreps):
    return sum(n * d for n, d, _ in irreps)


def _lane_layout(N, D):
    """Pick lane width L (multiple of 128 when possible) and row count R, N*D == R*L."""
    g = math.gcd(D, 128)
    L = D * (128 // g)                    # lcm(D, 128)
    if L > 0 and (N * D) % L == 0:
        return L, (N * D) // L, L // D
    return D, N, 1                        # fallback: channels-last (still correct)


def _make_static_tables(irreps, N, D, m):
    """Static numpy segment matrices, tiled to lane width L = m*D.

    seg_mean[l, k] = is_scalar_k / (N * n_k)  for lanes l belonging to irrep k
    seg_norm[l, k] = 1 / (N * n_k)            (block-mean denominator)
    seg_t[k, l]    = 1.0                      (one-hot broadcast-back)
    """
    K = len(irreps)
    Kp = max(8, -(-K // 8) * 8)           # pad block count to a multiple of 8 sublanes
    seg_mean = np.zeros((D, Kp), np.float32)
    seg_norm = np.zeros((D, Kp), np.float32)
    seg_t = np.zeros((Kp, D), np.float32)
    ix = 0
    for k, (n, d, is_scalar) in enumerate(irreps):
        width = n * d
        inv_cnt = 1.0 / float(N * n)
        seg_norm[ix:ix + width, k] = inv_cnt
        if is_scalar:
            seg_mean[ix:ix + width, k] = inv_cnt
        seg_t[k, ix:ix + width] = 1.0
        ix += width
    seg_mean = np.tile(seg_mean, (m, 1))  # (L, Kp)
    seg_norm = np.tile(seg_norm, (m, 1))  # (L, Kp)
    seg_t = np.tile(seg_t, (1, m))        # (Kp, L)
    return seg_mean, seg_norm, seg_t, Kp


def _expand_affine(weight, bias, irreps, D, m, L):
    """Per-channel weight/bias vectors, lane-tiled to width L. Jit-safe (no host sync)."""
    num_features = sum(n for n, _, _ in irreps)
    rep = np.concatenate([np.full((n,), d, np.int64) for n, d, _ in irreps])
    w_idx = np.repeat(np.arange(num_features), rep)       # (D,) static gather indices
    w_chan = jnp.asarray(weight, jnp.float32)[w_idx]       # (D,)

    scalar_pos = []
    ix = 0
    for n, d, is_scalar in irreps:
        if is_scalar:
            scalar_pos.extend(range(ix, ix + n))           # d == 1 for scalars
        ix += n * d
    b_chan = jnp.zeros((D,), jnp.float32)
    if scalar_pos:
        b_chan = b_chan.at[np.asarray(scalar_pos, np.int64)].set(
            jnp.asarray(bias, jnp.float32))

    w_lane = jnp.tile(w_chan, m).reshape(1, L)
    b_lane = jnp.tile(b_chan, m).reshape(1, L)
    return w_lane, b_lane


def _make_kernel(eps):
    def kernel(x_ref, w_ref, b_ref, segm_ref, segn_ref, segt_ref, o_ref):
        x = x_ref[...].astype(jnp.float32)                      # (Bt, R, L)

        # --- one shared reduction pass over the rows -------------------------
        colsum = jnp.sum(x, axis=1)                             # (Bt, L)
        colsumsq = jnp.sum(x * x, axis=1)                       # (Bt, L)

        # --- tiny segment contraction: per-irrep statistics -------------------
        segm = segm_ref[...]                                    # (L, K)
        segn = segn_ref[...]                                    # (L, K)
        segt = segt_ref[...]                                    # (K, L)
        mean_k = jnp.dot(colsum, segm, preferred_element_type=jnp.float32)   # (Bt, K)
        msq_k = jnp.dot(colsumsq, segn, preferred_element_type=jnp.float32)  # (Bt, K)
        var_k = msq_k - mean_k * mean_k                         # == E[(x-m)^2] per block
        inv_std_k = lax.rsqrt(var_k + eps)                      # (Bt, K)

        # --- broadcast back to per-lane scale/offset, fused affine ------------
        inv_std = jnp.dot(inv_std_k, segt, preferred_element_type=jnp.float32)  # (Bt, L)
        mean = jnp.dot(mean_k, segt, preferred_element_type=jnp.float32)        # (Bt, L)
        s = inv_std * w_ref[...]                                # (Bt, L)
        t = b_ref[...] - mean * s                               # (Bt, L)

        o_ref[...] = (x * s[:, None, :] + t[:, None, :]).astype(o_ref.dtype)
    return kernel


def layernorm_pallas(x, weight, bias, irreps=IRREPS, eps=EPS):
    """x: (batch, *size, dim_total). weight: (num_features,). bias: (num_scalar,)."""
    D = _irreps_dim(irreps)
    B = x.shape[0]
    size = x.shape[1:-1]
    assert x.shape[-1] == D
    N = int(np.prod(size, dtype=np.int64)) if size else 1

    L, R, m = _lane_layout(N, D)
    x_lane = x.reshape(B, R, L)

    seg_mean, seg_norm, seg_t, Kp = _make_static_tables(irreps, N, D, m)
    w_lane, b_lane = _expand_affine(weight, bias, irreps, D, m, L)

    # Pack multiple batch elements per grid step while the (double-buffered)
    # in+out block stays under the VMEM budget; keep >=2 grid steps for
    # megacore once the per-batch work is non-trivial.
    itemsize = np.dtype(x.dtype).itemsize
    per_batch_bytes = 2 * 2 * R * L * itemsize
    min_steps = 2 if (B >= 2 and per_batch_bytes >= (1 << 18)) else 1
    Bt = 1
    for cand in range(1, B + 1):
        if (B % cand == 0 and cand * per_batch_bytes <= _VMEM_BLOCK_BUDGET
                and B // cand >= min_steps):
            Bt = cand
    # TODO(synk): for per-batch slabs larger than the VMEM budget, switch to a
    # two-pass (stats-accumulate over a row-tiled "arbitrary" axis + normalize)
    # kernel instead of loading the full per-batch slab.

    kernel = _make_kernel(float(eps))
    out_lane = pl.pallas_call(
        kernel,
        out_shape=jax.ShapeDtypeStruct((B, R, L), x.dtype),
        grid=(B // Bt,),
        in_specs=[
            pl.BlockSpec((Bt, R, L), lambda b: (b, 0, 0)),
            pl.BlockSpec((1, L), lambda b: (0, 0)),
            pl.BlockSpec((1, L), lambda b: (0, 0)),
            pl.BlockSpec((L, Kp), lambda b: (0, 0)),
            pl.BlockSpec((L, Kp), lambda b: (0, 0)),
            pl.BlockSpec((Kp, L), lambda b: (0, 0)),
        ],
        out_specs=pl.BlockSpec((Bt, R, L), lambda b: (b, 0, 0)),
        compiler_params=pltpu.CompilerParams(
            dimension_semantics=("parallel",),
            vmem_limit_bytes=_VMEM_LIMIT_BYTES,
        ),
    )(x_lane, w_lane, b_lane,
      jnp.asarray(seg_mean), jnp.asarray(seg_norm), jnp.asarray(seg_t))

    return out_lane.reshape(B, *size, D)


def layernorm_ref(x, weight, bias, irreps=IRREPS, eps=EPS):
    """Pure-JAX reference mirroring the PyTorch forward."""
    dim_total = _irreps_dim(irreps)
    batch = x.shape[0]
    size = x.shape[1:-1]
    x3 = x.reshape(batch, -1, dim_total).astype(jnp.float32)
    ix = 0
    iw = 0
    ib = 0
    fields = []
    for (n, d, is_scalar) in irreps:
        field = x3[:, :, ix:ix + n * d]
        ix += n * d
        if is_scalar:
            field_mean = jnp.mean(field, axis=(1, 2), keepdims=True)
            field = field - field_mean
            field_norm = jnp.mean(field ** 2, axis=(1, 2), keepdims=True)
        else:
            sq = field.reshape(batch, field.shape[1], n, d)
            sqn = jnp.sum(sq ** 2, axis=-1)                       # (B, N, n)
            field_norm = jnp.mean(sqn, axis=(1, 2), keepdims=True)[..., None]
            field_norm = field_norm[:, :, :, 0]
        field_norm = (field_norm + eps) ** (-0.5)
        field = field * field_norm
        field = field.reshape(batch, -1, n, d)
        w = weight[iw:iw + n][None, None, :, None]
        iw += n
        if is_scalar:
            b = bias[ib:ib + n][None, None, :, None]
            ib += n
            field = field * w + b
        else:
            field = field * w
        fields.append(field.reshape(batch, -1, n * d))
    out = jnp.concatenate(fields, axis=2)
    return out.reshape(batch, *size, dim_total)


if __name__ == "__main__":
    dim_total = _irreps_dim(IRREPS)                       # 20
    num_features = sum(n for n, _, _ in IRREPS)           # 12
    num_scalar = sum(n for n, _, s in IRREPS if s)        # 8

    key = jax.random.PRNGKey(0)
    # (batch=2, size=(4, 16), dim=20) -> N=64, N*D=1280 = 2 lane-dense rows of 640.
    x = jax.random.normal(key, (2, 4, 16, dim_total), dtype=jnp.float32)

    # Deterministic parameters (module init is ones/zeros; perturb so the affine
    # path is exercised).
    weight = 1.0 + 0.1 * jnp.arange(num_features, dtype=jnp.float32)
    bias = 0.05 * jnp.arange(num_scalar, dtype=jnp.float32)

    fn = jax.jit(functools.partial(layernorm_pallas, irreps=IRREPS, eps=EPS))
    out = jax.block_until_ready(fn(x, weight, bias))

    ref = layernorm_ref(x, weight, bias)
    np.testing.assert_allclose(np.asarray(out), np.asarray(ref), rtol=1e-5, atol=1e-5)
    print("KERNEL_OK")
</pallas_src>

<mosaic_0001>
module attributes {stable_mosaic.version = 11 : i64} {
  func.func @kernel(%arg0: i32, %arg1: memref<2x2x640xf32, #tpu.memory_space<vmem>>, %arg2: memref<1x640xf32, #tpu.memory_space<vmem>>, %arg3: memref<1x640xf32, #tpu.memory_space<vmem>>, %arg4: memref<640x8xf32, #tpu.memory_space<vmem>>, %arg5: memref<640x8xf32, #tpu.memory_space<vmem>>, %arg6: memref<8x640xf32, #tpu.memory_space<vmem>>, %arg7: memref<2x2x640xf32, #tpu.memory_space<vmem>>) attributes {dimension_semantics = [#tpu.dimension_semantics<parallel>], iteration_bounds = array<i64: 1>, scalar_prefetch = 0 : i64, scratch_operands = 0 : i64, tpu.core_type = #tpu.core_type<tc>, window_params = [{transform_indices = @transform_0, window_bounds = array<i64: 2, 2, 640>}, {pipeline_mode = #tpu.pipeline_mode<synchronous>, transform_indices = @transform_1, window_bounds = array<i64: 1, 640>}, {pipeline_mode = #tpu.pipeline_mode<synchronous>, transform_indices = @transform_2, window_bounds = array<i64: 1, 640>}, {pipeline_mode = #tpu.pipeline_mode<synchronous>, transform_indices = @transform_3, window_bounds = array<i64: 640, 8>}, {pipeline_mode = #tpu.pipeline_mode<synchronous>, transform_indices = @transform_4, window_bounds = array<i64: 640, 8>}, {pipeline_mode = #tpu.pipeline_mode<synchronous>, transform_indices = @transform_5, window_bounds = array<i64: 8, 640>}, {transform_indices = @transform_6, window_bounds = array<i64: 2, 2, 640>}]} {
    %c0 = arith.constant 0 : index
    %c0_0 = arith.constant 0 : index
    %c0_1 = arith.constant 0 : index
    %0 = vector.load %arg1[%c0, %c0_0, %c0_1] : memref<2x2x640xf32, #tpu.memory_space<vmem>>, vector<2x2x640xf32>
    %cst = arith.constant dense<0.000000e+00> : vector<2x640xf32>
    %1 = vector.multi_reduction <add>, %0, %cst [1] : vector<2x2x640xf32> to vector<2x640xf32>
    %2 = arith.mulf %0, %0 : vector<2x2x640xf32>
    %cst_2 = arith.constant dense<0.000000e+00> : vector<2x640xf32>
    %3 = vector.multi_reduction <add>, %2, %cst_2 [1] : vector<2x2x640xf32> to vector<2x640xf32>
    %c0_3 = arith.constant 0 : index
    %c0_4 = arith.constant 0 : index
    %4 = vector.load %arg4[%c0_3, %c0_4] : memref<640x8xf32, #tpu.memory_space<vmem>>, vector<640x8xf32>
    %c0_5 = arith.constant 0 : index
    %c0_6 = arith.constant 0 : index
    %5 = vector.load %arg5[%c0_5, %c0_6] : memref<640x8xf32, #tpu.memory_space<vmem>>, vector<640x8xf32>
    %c0_7 = arith.constant 0 : index
    %c0_8 = arith.constant 0 : index
    %6 = vector.load %arg6[%c0_7, %c0_8] : memref<8x640xf32, #tpu.memory_space<vmem>>, vector<8x640xf32>
    %cst_9 = arith.constant dense<0.000000e+00> : vector<2x8xf32>
    %7 = tpu.matmul %1, %4, %cst_9 {dimension_numbers = #tpu.dot_dimension_numbers<[1], [0], [0], [1], [0, 0, 1, 1], [], []>} : vector<2x640xf32>, vector<640x8xf32>, vector<2x8xf32> -> vector<2x8xf32>
    %cst_10 = arith.constant dense<0.000000e+00> : vector<2x8xf32>
    %8 = tpu.matmul %3, %5, %cst_10 {dimension_numbers = #tpu.dot_dimension_numbers<[1], [0], [0], [1], [0, 0, 1, 1], [], []>} : vector<2x640xf32>, vector<640x8xf32>, vector<2x8xf32> -> vector<2x8xf32>
    %9 = arith.mulf %7, %7 : vector<2x8xf32>
    %10 = arith.subf %8, %9 : vector<2x8xf32>
    %cst_11 = arith.constant 9.99999974E-6 : f32
    %11 = vector.broadcast %cst_11 : f32 to vector<2x8xf32>
    %12 = arith.addf %10, %11 : vector<2x8xf32>
    %13 = math.rsqrt %12 : vector<2x8xf32>
    %cst_12 = arith.constant dense<0.000000e+00> : vector<2x640xf32>
    %14 = tpu.matmul %13, %6, %cst_12 {dimension_numbers = #tpu.dot_dimension_numbers<[1], [0], [0], [1], [0, 0, 1, 1], [], []>} : vector<2x8xf32>, vector<8x640xf32>, vector<2x640xf32> -> vector<2x640xf32>
    %cst_13 = arith.constant dense<0.000000e+00> : vector<2x640xf32>
    %15 = tpu.matmul %7, %6, %cst_13 {dimension_numbers = #tpu.dot_dimension_numbers<[1], [0], [0], [1], [0, 0, 1, 1], [], []>} : vector<2x8xf32>, vector<8x640xf32>, vector<2x640xf32> -> vector<2x640xf32>
    %c0_14 = arith.constant 0 : index
    %c0_15 = arith.constant 0 : index
    %16 = vector.load %arg2[%c0_14, %c0_15] : memref<1x640xf32, #tpu.memory_space<vmem>>, vector<1x640xf32>
    %17 = vector.broadcast %16 : vector<1x640xf32> to vector<2x640xf32>
    %18 = arith.mulf %14, %17 : vector<2x640xf32>
    %c0_16 = arith.constant 0 : index
    %c0_17 = arith.constant 0 : index
    %19 = vector.load %arg3[%c0_16, %c0_17] : memref<1x640xf32, #tpu.memory_space<vmem>>, vector<1x640xf32>
    %20 = arith.mulf %15, %18 : vector<2x640xf32>
    %21 = vector.broadcast %19 : vector<1x640xf32> to vector<2x640xf32>
    %22 = arith.subf %21, %20 : vector<2x640xf32>
    %23 = vector.shape_cast %18 : vector<2x640xf32> to vector<2x1x640xf32>
    %24 = vector.broadcast %23 : vector<2x1x640xf32> to vector<2x2x640xf32>
    %25 = arith.mulf %0, %24 : vector<2x2x640xf32>
    %26 = vector.shape_cast %22 : vector<2x640xf32> to vector<2x1x640xf32>
    %27 = vector.broadcast %26 : vector<2x1x640xf32> to vector<2x2x640xf32>
    %28 = arith.addf %25, %27 : vector<2x2x640xf32>
    %c0_18 = arith.constant 0 : index
    %c0_19 = arith.constant 0 : index
    %c0_20 = arith.constant 0 : index
    %29 = vector.load %arg7[%c0_18, %c0_19, %c0_20] : memref<2x2x640xf32, #tpu.memory_space<vmem>>, vector<2x2x640xf32>
    tpu.vector_store %arg7[%c0_18, %c0_19, %c0_20], %28 {strides = array<i32>} : memref<2x2x640xf32, #tpu.memory_space<vmem>>, vector<2x2x640xf32>,
    return
  }
  func.func @transform_0(%arg0: i32) -> (i32, i32, i32) {
    %c0_i32 = arith.constant 0 : i32
    %c0_i32_0 = arith.constant 0 : i32
    %c0_i32_1 = arith.constant 0 : i32
    return %arg0, %c0_i32, %c0_i32_0 : i32, i32, i32
  }
  func.func @transform_1(%arg0: i32) -> (i32, i32) {
    %c0_i32 = arith.constant 0 : i32
    %c0_i32_0 = arith.constant 0 : i32
    %c0_i32_1 = arith.constant 0 : i32
    return %c0_i32, %c0_i32_0 : i32, i32
  }
  func.func @transform_2(%arg0: i32) -> (i32, i32) {
    %c0_i32 = arith.constant 0 : i32
    %c0_i32_0 = arith.constant 0 : i32
    %c0_i32_1 = arith.constant 0 : i32
    return %c0_i32, %c0_i32_0 : i32, i32
  }
  func.func @transform_3(%arg0: i32) -> (i32, i32) {
    %c0_i32 = arith.constant 0 : i32
    %c0_i32_0 = arith.constant 0 : i32
    %c0_i32_1 = arith.constant 0 : i32
    return %c0_i32, %c0_i32_0 : i32, i32
  }
  func.func @transform_4(%arg0: i32) -> (i32, i32) {
    %c0_i32 = arith.constant 0 : i32
    %c0_i32_0 = arith.constant 0 : i32
    %c0_i32_1 = arith.constant 0 : i32
    return %c0_i32, %c0_i32_0 : i32, i32
  }
  func.func @transform_5(%arg0: i32) -> (i32, i32) {
    %c0_i32 = arith.constant 0 : i32
    %c0_i32_0 = arith.constant 0 : i32
    %c0_i32_1 = arith.constant 0 : i32
    return %c0_i32, %c0_i32_0 : i32, i32
  }
  func.func @transform_6(%arg0: i32) -> (i32, i32, i32) {
    %c0_i32 = arith.constant 0 : i32
    %c0_i32_0 = arith.constant 0 : i32
    %c0_i32_1 = arith.constant 0 : i32
    return %arg0, %c0_i32, %c0_i32_0 : i32, i32, i32
  }
}

</mosaic_0001>

<bundles_post_ra>
// kernel: tile.13
= control target key start
LH: loop header
LB: loop body
LE: loop exit
PB: predicated region body
PF: predicated region fallthrough
CT: control target
= control target key end

     0   :  { %s40_s0 = inlined_call_operand.vmem [shape: f32[20], index: 0, kind: input, shape index: {}]   ;;  %s41_s1 = inlined_call_operand.vmem [shape: f32[32,20], index: 1, kind: output, shape index: {}]  }
   0x1   :  { %v4_v0 = vld [vmem:[%s40_s0] ss:$0 sm:$0xff] }
   0x2   :  { %5 = vst [vmem:[%s41_s1] sm:$0xff] %v4_v0  ;;  %12 = vst [vmem:[%s41_s1 + $0x8] sm:$0xff] %v4_v0 }
   0x3   :  { %13 = vst [vmem:[%s41_s1 + $0x10] sm:$0xff] %v4_v0  ;;  %14 = vst [vmem:[%s41_s1 + $0x18] sm:$0xff] %v4_v0 }

// kernel: tile.14
= control target key start
LH: loop header
LB: loop body
LE: loop exit
PB: predicated region body
PF: predicated region fallthrough
CT: control target
= control target key end

     0   :  { %vm9_vm0 = vcmask 31744   ;;  %vm27_vm1 = vcmask 97280   ;;  %s352_s14 = smov 124   ;;  %vm23_vm2 = vcmask 64512   ;;  %s353_s19 = smov 116   ;;  %vm13_vm3 = vcmask 130048   ;;  %s524_s0 = inlined_call_operand.vmem [shape: f32[32,20], index: 0, kind: input, shape index: {}]   ;;  %s525_s1 = inlined_call_operand.vmem [shape: f32[1,640], index: 1, kind: output, shape index: {}]  }
   0x1   :  { %v282_v0 = vld [vmem:[%s524_s0 + $0x13] sm:$0x1]   ;;  %v286_v3 = vld [vmem:[%s524_s0 + $0x19] sm:$0x1]   ;;  %v284_v6 = vld [vmem:[%s524_s0 + $0x6] sm:$0x1]  }
   0x2   :  { %v283_v1 = vld [vmem:[%s524_s0 + $0x13] sm:$0x1]   ;;  %v287_v4 = vld [vmem:[%s524_s0 + $0x19] sm:$0x1]   ;;  %v285_v7 = vld [vmem:[%s524_s0 + $0x6] sm:$0x1]  }
   0x3   :  { %v10_v2 = vsel %vm9_vm0, %v283_v1, %v282_v0  ;;  %v37_v5 = vsel %vm27_vm1, %v287_v4, %v286_v3  ;;  %v24_v8 = vsel %vm23_vm2, %v285_v7, %v284_v6  ;;  %v288_v9 = vld [vmem:[%s524_s0 + $0xc] sm:$0x1]   ;;  %s354_s24 = smov 120   ;;  %s355_s25 = smov 112   ;;  %v290_v12 = vld [vmem:[%s524_s0 + $0x1f] sm:$0x1]  }
   0x4   :  { %11 = vrot.lane.b32.xlu0 %v10_v2, %s352_s14  ;;  %38 = vrot.lane.b32.xlu1 %v37_v5, %s353_s19  ;;  %v289_v10 = vld [vmem:[%s524_s0 + $0xc] sm:$0x1]   ;;  %v291_v13 = vld [vmem:[%s524_s0 + $0x12] sm:$0x1]   ;;  %s356_s30 = smov 108   ;;  %s357_s2 = smov 104  }
   0x5   :  { %v51_v11 = vsel %vm13_vm3, %v289_v10, %v288_v9  ;;  %v292_v14 = vld [vmem:[%s524_s0 + $0x5] sm:$0x1]   ;;  %v293_v15 = vld [vmem:[%s524_s0 + $0x18] sm:$0x1]   ;;  %s358_s7 = smov 100   ;;  %s359_s8 = smov 96  }
   0x6   :  { %v294_v16 = vld [vmem:[%s524_s0 + $0xb] sm:$0x1]   ;;  %v295_v17 = vld [vmem:[%s524_s0 + $0x1e] sm:$0x1]   ;;  %s360_s13 = smov 92   ;;  %vm3_vm4 = vcmask 162816  }
   0x7   :  { %v2_v18 = vld [vmem:[%s524_s0] sm:$0x1]   ;;  %s361_s16 = smov 88   ;;  %v296_v19 = vld [vmem:[%s524_s0 + $0x11] sm:$0x1]   ;;  %s362_s21 = smov 84  }
   0x8   :  { %25 = vrot.lane.b32.xlu0 %v24_v8, %s354_s24  ;;  %52 = vrot.lane.b32.xlu1 %v51_v11, %s355_s25  ;;  %4 = vst.msk [vmem:[#allocation0] sm:$0x1] %vm3_vm4, %v2_v18   ;;  %v297_v20 = vld [vmem:[%s524_s0 + $0x4] sm:$0x1]   ;;  %s363_s22 = smov 80   ;;  %s364_s27 = smov 76  }
   0x9   :  { %v298_v21 = vld [vmem:[%s524_s0 + $0x17] sm:$0x1]   ;;  %v299_v22 = vld [vmem:[%s524_s0 + $0xa] sm:$0x1]   ;;  %s365_s28 = smov 72   ;;  %s366_s4 = smov 68  }
   0xa   :  { %v300_v23 = vld [vmem:[%s524_s0 + $0x1d] sm:$0x1]   ;;  %v301_v24 = vld [vmem:[%s524_s0 + $0x10] sm:$0x1]   ;;  %s367_s5 = smov 64   ;;  %s368_s10 = smov 60  }
   0xb   :  { %v302_v25 = vld [vmem:[%s524_s0 + $0x3] sm:$0x1]   ;;  %v303_v26 = vld [vmem:[%s524_s0 + $0x16] sm:$0x1]   ;;  %s369_s11 = smov 56   ;;  %s371_s17 = smov 48  }
   0xc   :  { %62 = vrot.lane.b32.xlu0 %v290_v12, %s356_s30  ;;  %69 = vrot.lane.b32.xlu1 %v291_v13, %s357_s2  ;;  %v304_v27 = vld [vmem:[%s524_s0 + $0x9] sm:$0x1]   ;;  %v305_v28 = vld [vmem:[%s524_s0 + $0x1c] sm:$0x1]   ;;  %s373_s23 = smov 40   ;;  %s375_s29 = smov 32  }
   0xd   :  { %v306_v29 = vld [vmem:[%s524_s0 + $0xf] sm:$0x1]   ;;  %v307_v30 = vld [vmem:[%s524_s0 + $0x2] sm:$0x1]   ;;  %v308_v31 = vld [vmem:[%s524_s0 + $0x15] sm:$0x1]  }
   0xe   :  { %v309_v32 = vld [vmem:[%s524_s0 + $0x8] sm:$0x1]   ;;  %v310_v33 = vld [vmem:[%s524_s0 + $0x1b] sm:$0x1]   ;;  %v311_v34 = vld [vmem:[%s524_s0 + $0xe] sm:$0x1]  }
   0xf   :  { %s377_s6 = smov 24   ;;  %v312_v35 = vld [vmem:[%s524_s0 + $0x1] sm:$0x1]   ;;  %v313_v36 = vld [vmem:[%s524_s0 + $0x14] sm:$0x1]   ;;  %s379_s12 = smov 16  }
  0x10   :  { %76 = vrot.lane.b32.xlu0 %v292_v14, %s358_s7  ;;  %82 = vrot.lane.b32.xlu1 %v293_v15, %s359_s8  ;;  %v314_v37 = vld [vmem:[%s524_s0 + $0x7] sm:$0x1]   ;;  %v315_v38 = vld [vmem:[%s524_s0 + $0x1a] sm:$0x1]   ;;  %s381_s18 = smov 8   ;;  %vm16_vm5 = vcmask 1048544  }
  0x11   :  { %v316_v39 = vld [vmem:[%s524_s0 + $0xd] sm:$0x1]   ;;  %s382_s0 = smov 4   ;;  %vm43_vm6 = vcmask 1048480   ;;  %vm30_vm7 = vcmask 1048512   ;;  %vm57_vm8 = vcmask 1048448  }
  0x12   :  { %vm64_vm9 = vcmask 1048416   ;;  %vm71_vm10 = vcmask 1015616   ;;  %vm78_vm11 = vcmask 982816   ;;  %vm84_vm12 = vcmask 950016  }
  0x13   :  { %vm91_vm13 = vcmask 917216   ;;  %vm98_vm14 = vcmask 884416   ;;  %vm105_vm15 = vcmask 851616   ;;  %vm139_vm4 = vcmask 687616  }
  0x14   :  { %89 = vrot.lane.b32.xlu0 %v294_v16, %s360_s13  ;;  %96 = vrot.lane.b32.xlu1 %v295_v17, %s361_s16  ;;  %s370_s16 = smov 52  }
  0x18   :  { %103 = vrot.lane.b32.xlu0 %v296_v19, %s362_s21  ;;  %110 = vrot.lane.b32.xlu1 %v297_v20, %s363_s22  ;;  %s372_s22 = smov 44  }
  0x1c   :  { %116 = vrot.lane.b32.xlu0 %v298_v21, %s364_s27  ;;  %123 = vrot.lane.b32.xlu1 %v299_v22, %s365_s28  ;;  %s374_s28 = smov 36  }
  0x20   :  { %130 = vrot.lane.b32.xlu0 %v300_v23, %s366_s4  ;;  %137 = vrot.lane.b32.xlu1 %v301_v24, %s367_s5  ;;  %s376_s5 = smov 28  }
  0x24   :  { %144 = vrot.lane.b32.xlu0 %v302_v25, %s368_s10  ;;  %150 = vrot.lane.b32.xlu1 %v303_v26, %s369_s11  ;;  %s378_s11 = smov 20  }
  0x28   :  { %157 = vrot.lane.b32.xlu0 %v304_v27, %s370_s16  ;;  %164 = vrot.lane.b32.xlu1 %v305_v28, %s371_s17  ;;  %s380_s17 = smov 12  }
  0x2c   :  { %171 = vrot.lane.b32.xlu0 %v306_v29, %s372_s22  ;;  %178 = vrot.lane.b32.xlu1 %v307_v30, %s373_s23 }
  0x30   :  { %184 = vrot.lane.b32.xlu0 %v308_v31, %s374_s28  ;;  %191 = vrot.lane.b32.xlu1 %v309_v32, %s375_s29 }
  0x34   :  { %198 = vrot.lane.b32.xlu0 %v310_v33, %s376_s5  ;;  %205 = vrot.lane.b32.xlu1 %v311_v34, %s377_s6 }
  0x38   :  { %212 = vrot.lane.b32.xlu0 %v312_v35, %s378_s11  ;;  %218 = vrot.lane.b32.xlu1 %v313_v36, %s379_s12 }
  0x3c   :  { %225 = vrot.lane.b32.xlu0 %v314_v37, %s380_s17  ;;  %232 = vrot.lane.b32.xlu1 %v315_v38, %s381_s18 }
  0x40   :  { %239 = vrot.lane.b32.xlu0 %v316_v39, %s382_s0 }
  0x76   :  { %v12_v40 = vpop.permute.xlu0 %11   ;;  %v39_v41 = vpop.permute.xlu1 %38  }
  0x77   :  { %15 = vst.msk [vmem:[#allocation0 + $0x18] sm:$0x1] %vm13_vm3, %v12_v40   ;;  %vm132_vm3 = vcmask 720416  }
  0x78   :  { %18 = vst.msk [vmem:[#allocation0 + $0x10] sm:$0x1] %vm16_vm5, %v12_v40   ;;  %vm146_vm5 = vcmask 654816  }
  0x79   :  { %42 = vst.msk [vmem:[#allocation0 + $0x20] sm:$0x1] %vm23_vm2, %v39_v41   ;;  %vm125_vm2 = vcmask 753216  }
  0x7a   :  { %45 = vst.msk [vmem:[#allocation0 + $0x18] sm:$0x1] %vm43_vm6, %v39_v41   ;;  %v26_v42 = vpop.permute.xlu0 %25   ;;  %v53_v43 = vpop.permute.xlu1 %52   ;;  %vm152_vm6 = vcmask 622016  }
  0x7b   :  { %29 = vst.msk [vmem:[#allocation0 + $0x8] sm:$0x1] %vm27_vm1, %v26_v42   ;;  %vm118_vm1 = vcmask 786016  }
  0x7c   :  { %31 = vst.msk [vmem:[#allocation0] sm:$0x1] %vm30_vm7, %v26_v42   ;;  %vm159_vm7 = vcmask 589216  }
  0x7d   :  { %56 = vst.msk [vmem:[#allocation0 + $0x10] sm:$0x1] %vm9_vm0, %v53_v43   ;;  %vm112_vm0 = vcmask 818816  }
  0x7e   :  { %59 = vst.msk [vmem:[#allocation0 + $0x8] sm:$0x1] %vm57_vm8, %v53_v43   ;;  %v63_v44 = vpop.permute.xlu0 %62   ;;  %v70_v45 = vpop.permute.xlu1 %69   ;;  %vm166_vm8 = vcmask 556416  }
  0x7f   :  { %66 = vst.msk [vmem:[#allocation0 + $0x20] sm:$0x1] %vm64_vm9, %v63_v44   ;;  %vm173_vm9 = vcmask 523616  }
  0x80   :  { %73 = vst.msk [vmem:[#allocation0 + $0x10] sm:$0x1] %vm71_vm10, %v70_v45   ;;  %vm180_vm10 = vcmask 490816  }
  0x82   :  { %v77_v46 = vpop.permute.xlu0 %76   ;;  %v83_v47 = vpop.permute.xlu1 %82  }
  0x83   :  { %79 = vst.msk [vmem:[#allocation0] sm:$0x1] %vm78_vm11, %v77_v46   ;;  %vm186_vm11 = vcmask 458016  }
  0x84   :  { %86 = vst.msk [vmem:[#allocation0 + $0x18] sm:$0x1] %vm84_vm12, %v83_v47   ;;  %vm193_vm12 = vcmask 425216  }
  0x86   :  { %v90_v48 = vpop.permute.xlu0 %89   ;;  %v97_v49 = vpop.permute.xlu1 %96  }
  0x87   :  { %93 = vst.msk [vmem:[#allocation0 + $0x8] sm:$0x1] %vm91_vm13, %v90_v48   ;;  %vm200_vm13 = vcmask 392416  }
  0x88   :  { %100 = vst.msk [vmem:[#allocation0 + $0x20] sm:$0x1] %vm98_vm14, %v97_v49   ;;  %vm207_vm14 = vcmask 359616  }
  0x8a   :  { %v104_v50 = vpop.permute.xlu0 %103   ;;  %v111_v51 = vpop.permute.xlu1 %110  }
  0x8b   :  { %107 = vst.msk [vmem:[#allocation0 + $0x10] sm:$0x1] %vm105_vm15, %v104_v50   ;;  %vm214_vm15 = vcmask 326816  }
  0x8c   :  { %113 = vst.msk [vmem:[#allocation0] sm:$0x1] %vm112_vm0, %v111_v51   ;;  %vm220_vm0 = vcmask 294016  }
  0x8e   :  { %v117_v52 = vpop.permute.xlu0 %116   ;;  %v124_v53 = vpop.permute.xlu1 %123  }
  0x8f   :  { %120 = vst.msk [vmem:[#allocation0 + $0x18] sm:$0x1] %vm118_vm1, %v117_v52   ;;  %vm227_vm1 = vcmask 261216  }
  0x90   :  { %127 = vst.msk [vmem:[#allocation0 + $0x8] sm:$0x1] %vm125_vm2, %v124_v53   ;;  %vm234_vm2 = vcmask 228416  }
  0x92   :  { %v131_v54 = vpop.permute.xlu0 %130   ;;  %v138_v55 = vpop.permute.xlu1 %137  }
  0x93   :  { %134 = vst.msk [vmem:[#allocation0 + $0x20] sm:$0x1] %vm132_vm3, %v131_v54   ;;  %vm241_vm3 = vcmask 195616  }
  0x94   :  { %141 = vst.msk [vmem:[#allocation0 + $0x10] sm:$0x1] %vm139_vm4, %v138_v55  }
  0x96   :  { %v145_v56 = vpop.permute.xlu0 %144   ;;  %v151_v57 = vpop.permute.xlu1 %150  }
  0x97   :  { %147 = vst.msk [vmem:[#allocation0] sm:$0x1] %vm146_vm5, %v145_v56  }
  0x98   :  { %154 = vst.msk [vmem:[#allocation0 + $0x18] sm:$0x1] %vm152_vm6, %v151_v57  }
  0x9a   :  { %v158_v58 = vpop.permute.xlu0 %157   ;;  %v165_v59 = vpop.permute.xlu1 %164  }
  0x9b   :  { %161 = vst.msk [vmem:[#allocation0 + $0x8] sm:$0x1] %vm159_vm7, %v158_v58  }
  0x9c   :  { %168 = vst.msk [vmem:[#allocation0 + $0x20] sm:$0x1] %vm166_vm8, %v165_v59  }
  0x9e   :  { %v172_v60 = vpop.permute.xlu0 %171   ;;  %v179_v61 = vpop.permute.xlu1 %178  }
  0x9f   :  { %175 = vst.msk [vmem:[#allocation0 + $0x10] sm:$0x1] %vm173_vm9, %v172_v60  }
  0xa0   :  { %181 = vst.msk [vmem:[#allocation0] sm:$0x1] %vm180_vm10, %v179_v61  }
  0xa2   :  { %v185_v62 = vpop.permute.xlu0 %184   ;;  %v192_v63 = vpop.permute.xlu1 %191  }
  0xa3   :  { %188 = vst.msk [vmem:[#allocation0 + $0x18] sm:$0x1] %vm186_vm11, %v185_v62  }
  0xa4   :  { %195 = vst.msk [vmem:[#allocation0 + $0x8] sm:$0x1] %vm193_vm12, %v192_v63  }
  0xa6   :  { %v199_v0 = vpop.permute.xlu0 %198   ;;  %v206_v1 = vpop.permute.xlu1 %205  }
  0xa7   :  { %202 = vst.msk [vmem:[#allocation0 + $0x20] sm:$0x1] %vm200_vm13, %v199_v0  }
  0xa8   :  { %209 = vst.msk [vmem:[#allocation0 + $0x10] sm:$0x1] %vm207_vm14, %v206_v1  }
  0xaa   :  { %v213_v2 = vpop.permute.xlu0 %212   ;;  %v219_v3 = vpop.permute.xlu1 %218  }
  0xab   :  { %215 = vst.msk [vmem:[#allocation0] sm:$0x1] %vm214_vm15, %v213_v2  }
  0xac   :  { %222 = vst.msk [vmem:[#allocation0 + $0x18] sm:$0x1] %vm220_vm0, %v219_v3  }
  0xae   :  { %v226_v4 = vpop.permute.xlu0 %225   ;;  %v233_v5 = vpop.permute.xlu1 %232  }
  0xaf   :  { %229 = vst.msk [vmem:[#allocation0 + $0x8] sm:$0x1] %vm227_vm1, %v226_v4  }
  0xb0   :  { %236 = vst.msk [vmem:[#allocation0 + $0x20] sm:$0x1] %vm234_vm2, %v233_v5  }
  0xb2   :  { %v248_v6 = vld [vmem:[#allocation0] sm:$0x1]  ;;  %v240_v7 = vpop.permute.xlu0 %239  }
  0xb3   :  { %251 = vst [vmem:[%s525_s1] sm:$0x1] %v248_v6  ;;  %v266_v8 = vld [vmem:[#allocation0 + $0x18] sm:$0x1]  ;;  %243 = vst.msk [vmem:[#allocation0 + $0x10] sm:$0x1] %vm241_vm3, %v240_v7  }
  0xb4   :  { %319 = vst [vmem:[%s525_s1 + $0x3] sm:$0x1] %v266_v8 }
  0xb6   :  { %v253_v9 = vld [vmem:[#allocation0 + $0x8] sm:$0x1] }
  0xb7   :  { %317 = vst [vmem:[%s525_s1 + $0x1] sm:$0x1] %v253_v9  ;;  %v273_v10 = vld [vmem:[#allocation0 + $0x20] sm:$0x1] }
  0xb8   :  { %320 = vst [vmem:[%s525_s1 + $0x4] sm:$0x1] %v273_v10 }
  0xba   :  { %v259_v11 = vld [vmem:[#allocation0 + $0x10] sm:$0x1] }
  0xbb   :  { %318 = vst [vmem:[%s525_s1 + $0x2] sm:$0x1] %v259_v11 }

// kernel: layernorm_pallas.1
= control target key start
LH: loop header
LB: loop body
LE: loop exit
PB: predicated region body
PF: predicated region fallthrough
CT: control target
= control target key end

     0   :  { %v2023_v26 = vmov 1983009808   ;;  %v35_v28 = vlaneseq  ;;  %vm89_vm0 = vcmask 1041408   ;;  %vm471_vm1 = vcmask 1041409   ;;  %s2820_s3 = inlined_call_operand.vmem [shape: f32[640,8], index: 3, kind: input, shape index: {}]   ;;  %s2821_s0 = inlined_call_operand.vmem [shape: f32[2,2,640], index: 0, kind: input, shape index: {}]   ;;  %s2822_s4 = inlined_call_operand.vmem [shape: f32[640,8], index: 4, kind: input, shape index: {}]   ;;  %s2823_s5 = inlined_call_operand.vmem [shape: f32[8,640], index: 5, kind: input, shape index: {}]   ;;  %s2824_s1 = inlined_call_operand.vmem [shape: f32[1,640], index: 1, kind: input, shape index: {}]   ;;  %s2825_s2 = inlined_call_operand.vmem [shape: f32[1,640], index: 2, kind: input, shape index: {}]   ;;  %s2826_s6 = inlined_call_operand.vmem [shape: f32[2,2,640], index: 6, kind: output, shape index: {}]  }
   0x1   :  { %v327_v0 = vld [vmem:[%s2820_s3 + $0xf8] sm:$0xff]  ;;  %v326_v4 = vld [vmem:[%s2820_s3 + $0xf0] sm:$0xff]  ;;  %v325_v8 = vld [vmem:[%s2820_s3 + $0xe8] sm:$0xff]  ;;  %v33_v27 = vunpack.c.l.s4 %v2023_v26  ;;  %vm2025_vm2 = vmmov 0   ;;  %vm926_vm3 = vcmask 64512  }
   0x2   :  { %v359_v1 = vld [vmem:[%s2820_s3 + $0x1f8] sm:$0xff]  ;;  %1754 = vmatprep.subr.mxu0 %v327_v0  ;;  %v358_v5 = vld [vmem:[%s2820_s3 + $0x1f0] sm:$0xff]  ;;  %v357_v9 = vld [vmem:[%s2820_s3 + $0x1e8] sm:$0xff]  ;;  %v2164_v38 = vshrl.u32 %v35_v28, 7 }
   0x3   :  { %v311_v2 = vld [vmem:[%s2820_s3 + $0x78] sm:$0xff]  ;;  %1789 = vmatprep.subr.mxu1 %v359_v1  ;;  %v310_v6 = vld [vmem:[%s2820_s3 + $0x70] sm:$0xff]  ;;  %v309_v10 = vld [vmem:[%s2820_s3 + $0x68] sm:$0xff]  ;;  %v34_v37 = vunpack.c.0.s8 %v33_v27 }
   0x4   :  { %v343_v3 = vld [vmem:[%s2820_s3 + $0x178] sm:$0xff]  ;;  %1755 = vmatpush3.msra.mxu0 %v311_v2  ;;  %v342_v7 = vld [vmem:[%s2820_s3 + $0x170] sm:$0xff]  ;;  %v341_v11 = vld [vmem:[%s2820_s3 + $0x168] sm:$0xff] }
   0x5   :  { %1790 = vmatpush3.msra.mxu1 %v343_v3  ;;  %1756 = vmatprep.subr.mxu0 %v326_v4  ;;  %v324_v12 = vld [vmem:[%s2820_s3 + $0xe0] sm:$0xff]  ;;  %v323_v16 = vld [vmem:[%s2820_s3 + $0xd8] sm:$0xff]  ;;  %v322_v20 = vld [vmem:[%s2820_s3 + $0xd0] sm:$0xff]  ;;  %v2191_v47 = vsub.s32 %v34_v37, %v2164_v38 }
   0x6   :  { %1791 = vmatprep.subr.mxu1 %v358_v5  ;;  %1757 = vmatpush3.msra.mxu0 %v310_v6  ;;  %v356_v13 = vld [vmem:[%s2820_s3 + $0x1e0] sm:$0xff]  ;;  %v355_v17 = vld [vmem:[%s2820_s3 + $0x1d8] sm:$0xff]  ;;  %v354_v21 = vld [vmem:[%s2820_s3 + $0x1d0] sm:$0xff] }
   0x7   :  { %1792 = vmatpush3.msra.mxu1 %v342_v7  ;;  %1758 = vmatprep.subr.mxu0 %v325_v8  ;;  %v308_v14 = vld [vmem:[%s2820_s3 + $0x60] sm:$0xff]  ;;  %v307_v18 = vld [vmem:[%s2820_s3 + $0x58] sm:$0xff]  ;;  %v306_v22 = vld [vmem:[%s2820_s3 + $0x50] sm:$0xff] }
   0x8   :  { %1793 = vmatprep.subr.mxu1 %v357_v9  ;;  %v340_v15 = vld [vmem:[%s2820_s3 + $0x160] sm:$0xff]  ;;  %1759 = vmatpush3.msra.mxu0 %v309_v10  ;;  %v339_v19 = vld [vmem:[%s2820_s3 + $0x158] sm:$0xff]  ;;  %v338_v23 = vld [vmem:[%s2820_s3 + $0x150] sm:$0xff] }
   0x9   :  { %1794 = vmatpush3.msra.mxu1 %v341_v11  ;;  %1760 = vmatprep.subr.mxu0 %v324_v12  ;;  %v321_v24 = vld [vmem:[%s2820_s3 + $0xc8] sm:$0xff]  ;;  %v320_v31 = vld [vmem:[%s2820_s3 + $0xc0] sm:$0xff]  ;;  %v319_v35 = vld [vmem:[%s2820_s3 + $0xb8] sm:$0xff] }
   0xa   :  { %1795 = vmatprep.subr.mxu1 %v356_v13  ;;  %1761 = vmatpush3.msra.mxu0 %v308_v14  ;;  %v353_v25 = vld [vmem:[%s2820_s3 + $0x1c8] sm:$0xff]  ;;  %v352_v32 = vld [vmem:[%s2820_s3 + $0x1c0] sm:$0xff]  ;;  %v351_v36 = vld [vmem:[%s2820_s3 + $0x1b8] sm:$0xff] }
   0xb   :  { %1796 = vmatpush3.msra.mxu1 %v340_v15  ;;  %1762 = vmatprep.subr.mxu0 %v323_v16  ;;  %v305_v29 = vld [vmem:[%s2820_s3 + $0x48] sm:$0xff]  ;;  %v304_v33 = vld [vmem:[%s2820_s3 + $0x40] sm:$0xff]  ;;  %v303_v39 = vld [vmem:[%s2820_s3 + $0x38] sm:$0xff] }
   0xc   :  { %1797 = vmatprep.subr.mxu1 %v355_v17  ;;  %1763 = vmatpush3.msra.mxu0 %v307_v18  ;;  %v337_v30 = vld [vmem:[%s2820_s3 + $0x148] sm:$0xff]  ;;  %v336_v34 = vld [vmem:[%s2820_s3 + $0x140] sm:$0xff]  ;;  %v335_v40 = vld [vmem:[%s2820_s3 + $0x138] sm:$0xff] }
   0xd   :  { %1798 = vmatpush3.msra.mxu1 %v339_v19  ;;  %1764 = vmatprep.subr.mxu0 %v322_v20  ;;  %v318_v41 = vld [vmem:[%s2820_s3 + $0xb0] sm:$0xff]  ;;  %v317_v45 = vld [vmem:[%s2820_s3 + $0xa8] sm:$0xff]  ;;  %v316_v50 = vld [vmem:[%s2820_s3 + $0xa0] sm:$0xff] }
   0xe   :  { %1799 = vmatprep.subr.mxu1 %v354_v21  ;;  %1765 = vmatpush3.msra.mxu0 %v306_v22  ;;  %v350_v42 = vld [vmem:[%s2820_s3 + $0x1b0] sm:$0xff]  ;;  %v349_v46 = vld [vmem:[%s2820_s3 + $0x1a8] sm:$0xff]  ;;  %v348_v51 = vld [vmem:[%s2820_s3 + $0x1a0] sm:$0xff] }
   0xf   :  { %1800 = vmatpush3.msra.mxu1 %v338_v23  ;;  %1766 = vmatprep.subr.mxu0 %v321_v24  ;;  %v302_v43 = vld [vmem:[%s2820_s3 + $0x30] sm:$0xff]  ;;  %v301_v48 = vld [vmem:[%s2820_s3 + $0x28] sm:$0xff]  ;;  %v300_v52 = vld [vmem:[%s2820_s3 + $0x20] sm:$0xff] }
  0x10   :  { %1801 = vmatprep.subr.mxu1 %v353_v25  ;;  %1767 = vmatpush3.msra.mxu0 %v305_v29  ;;  %v334_v44 = vld [vmem:[%s2820_s3 + $0x130] sm:$0xff]  ;;  %v333_v49 = vld [vmem:[%s2820_s3 + $0x128] sm:$0xff]  ;;  %v332_v53 = vld [vmem:[%s2820_s3 + $0x120] sm:$0xff] }
  0x11   :  { %1802 = vmatpush3.msra.mxu1 %v337_v30  ;;  %1768 = vmatprep.subr.mxu0 %v320_v31  ;;  %v23_v54 = vld [vmem:[%s2821_s0] sm:$0xff]  ;;  %v25_v55 = vld [vmem:[%s2821_s0 + $0xa] sm:$0xff]  ;;  %v315_v56 = vld [vmem:[%s2820_s3 + $0x98] sm:$0xff] }
  0x12   :  { %1803 = vmatprep.subr.mxu1 %v352_v32  ;;  %1769 = vmatpush3.msra.mxu0 %v304_v33  ;;  %v347_v57 = vld [vmem:[%s2820_s3 + $0x198] sm:$0xff]  ;;  %v38_v58 = vrot.slane %v23_v54, %v2191_v47  ;;  %v62_v59 = vrot.slane %v25_v55, %v2191_v47  ;;  %v31_v60 = vcombine.high %v23_v54, %v23_v54  ;;  %v314_v2 = vld [vmem:[%s2820_s3 + $0x90] sm:$0xff]  ;;  %v313_v14 = vld [vmem:[%s2820_s3 + $0x88] sm:$0xff] }
  0x13   :  { %1804 = vmatpush3.msra.mxu1 %v336_v34  ;;  %1770 = vmatprep.subr.mxu0 %v319_v35  ;;  %v299_v61 = vld [vmem:[%s2820_s3 + $0x18] sm:$0xff]  ;;  %v55_v63 = vcombine.high %v25_v55, %v25_v55  ;;  %v2231_v0 = vmul.f32 %v23_v54, %v23_v54  ;;  %v2233_v1 = vmul.f32 %v25_v55, %v25_v55  ;;  %v346_v3 = vld [vmem:[%s2820_s3 + $0x190] sm:$0xff]  ;;  %v345_v15 = vld [vmem:[%s2820_s3 + $0x188] sm:$0xff] }
  0x14   :  { %1805 = vmatprep.subr.mxu1 %v351_v36  ;;  %1771 = vmatpush3.msra.mxu0 %v303_v39  ;;  %v331_v62 = vld [vmem:[%s2820_s3 + $0x118] sm:$0xff]  ;;  %v46_v4 = vcombine.high %v38_v58, %v38_v58  ;;  %v70_v5 = vcombine.high %v62_v59, %v62_v59  ;;  %v45_v6 = vrot.slane %v31_v60, %v2191_v47  ;;  %v90_v7 = vsel %vm89_vm0, %v38_v58, 0.0  ;;  %v298_v8 = vld [vmem:[%s2820_s3 + $0x10] sm:$0xff]  ;;  %v297_v20 = vld [vmem:[%s2820_s3 + $0x8] sm:$0xff] }
  0x15   :  { %1806 = vmatpush3.msra.mxu1 %v335_v40  ;;  %1772 = vmatprep.subr.mxu0 %v318_v41  ;;  %v330_v9 = vld [vmem:[%s2820_s3 + $0x110] sm:$0xff]  ;;  %v69_v10 = vrot.slane %v55_v63, %v2191_v47  ;;  %v91_v11 = vrot.slane %v90_v7, 4  ;;  %v125_v12 = vsel %vm89_vm0, %v62_v59, 0.0  ;;  %v2253_v13 = vrot.slane %v2231_v0, %v2191_v47  ;;  %v329_v21 = vld [vmem:[%s2820_s3 + $0x108] sm:$0xff]  ;;  %v312_v26 = vld [vmem:[%s2820_s3 + $0x80] sm:$0xff] }
  0x16   :  { %1807 = vmatprep.subr.mxu1 %v350_v42  ;;  %1773 = vmatpush3.msra.mxu0 %v302_v43  ;;  %v97_v16 = vsel %vm89_vm0, %v46_v4, 0.0  ;;  %v132_v17 = vsel %vm89_vm0, %v70_v5, 0.0  ;;  %v47_v18 = vcombine.high %v45_v6, %v45_v6  ;;  %v126_v19 = vrot.slane %v125_v12, 4  ;;  %v344_v27 = vld [vmem:[%s2820_s3 + $0x180] sm:$0xff]  ;;  %v407_v43 = vld [vmem:[%s2822_s4 + $0xf8] sm:$0xff] }
  0x17   :  { %1808 = vmatpush3.msra.mxu1 %v334_v44  ;;  %1774 = vmatprep.subr.mxu0 %v317_v45  ;;  %v98_v22 = vrot.slane %v97_v16, 4  ;;  %v133_v23 = vrot.slane %v132_v17, 4  ;;  %v71_v24 = vcombine.high %v69_v10, %v69_v10  ;;  %v92_v25 = vadd.f32 %v91_v11, %v90_v7  ;;  %v296_v32 = vld [vmem:[%s2820_s3] sm:$0xff]  ;;  %v2292_v11 = vld [vmem:[%s2821_s0 + $0x8] sm:$0x3] }
  0x18   :  { %1809 = vmatprep.subr.mxu1 %v349_v46  ;;  %1775 = vmatpush3.msra.mxu0 %v301_v48  ;;  %v111_v28 = vsel %vm89_vm0, %v47_v18, 0.0  ;;  %v127_v29 = vadd.f32 %v126_v19, %v125_v12  ;;  %v104_v30 = vsel %vm89_vm0, %v45_v6, 0.0  ;;  %v139_v31 = vsel %vm89_vm0, %v69_v10, 0.0  ;;  %v328_v35 = vld [vmem:[%s2820_s3 + $0x100] sm:$0xff]  ;;  %v2297_v12 = vld [vmem:[%s2821_s0 + $0x12] sm:$0x3] }
  0x19   :  { %1810 = vmatpush3.msra.mxu1 %v333_v49  ;;  %1776 = vmatprep.subr.mxu0 %v316_v50  ;;  %v99_v33 = vadd.f32 %v98_v22, %v97_v16  ;;  %v134_v34 = vadd.f32 %v133_v23, %v132_v17  ;;  %v112_v36 = vrot.slane %v111_v28, 4  ;;  %v146_v37 = vsel %vm89_vm0, %v71_v24, 0.0 }
  0x1a   :  { %1811 = vmatprep.subr.mxu1 %v348_v51  ;;  %1777 = vmatpush3.msra.mxu0 %v300_v52  ;;  %v147_v39 = vrot.slane %v146_v37, 4  ;;  %v93_v40 = vrot.slane %v92_v25, 2  ;;  %v128_v41 = vrot.slane %v127_v29, 2  ;;  %v105_v42 = vrot.slane %v104_v30, 4 }
  0x1b   :  { %1812 = vmatpush3.msra.mxu1 %v332_v53  ;;  %1778 = vmatprep.subr.mxu0 %v315_v56  ;;  %v100_v44 = vrot.slane %v99_v33, 2  ;;  %v135_v45 = vrot.slane %v134_v34, 2  ;;  %v113_v46 = vadd.f32 %v112_v36, %v111_v28  ;;  %v140_v48 = vrot.slane %v139_v31, 4  ;;  %v374_v28 = vld [vmem:[%s2820_s3 + $0x270] sm:$0xff] }
  0x1c   :  { %1813 = vmatprep.subr.mxu1 %v347_v57  ;;  %1779 = vmatpush3.msra.mxu0 %v299_v61  ;;  %v148_v49 = vadd.f32 %v147_v39, %v146_v37  ;;  %v94_v50 = vadd.f32 %v93_v40, %v92_v25  ;;  %v129_v51 = vadd.f32 %v128_v41, %v127_v29  ;;  %v2024_v56 = vmov 0.0   ;;  %v406_v40 = vld [vmem:[%s2822_s4 + $0xf0] sm:$0xff] }
  0x1d   :  { %1814 = vmatpush3.msra.mxu1 %v331_v62  ;;  %1780 = vmatprep.subr.mxu0 %v314_v2  ;;  %v101_v52 = vadd.f32 %v100_v44, %v99_v33  ;;  %v136_v53 = vadd.f32 %v135_v45, %v134_v34  ;;  %v114_v54 = vrot.slane %v113_v46, 2  ;;  %v106_v55 = vadd.f32 %v105_v42, %v104_v30  ;;  %v373_v34 = vld [vmem:[%s2820_s3 + $0x268] sm:$0xff]  ;;  %v372_v42 = vld [vmem:[%s2820_s3 + $0x260] sm:$0xff] }
  0x1e   :  { %1815 = vmatprep.subr.mxu1 %v346_v3  ;;  %1781 = vmatpush3.msra.mxu0 %v298_v8  ;;  %v149_v57 = vrot.slane %v148_v49, 2  ;;  %v95_v58 = vrot.slane %v94_v50, 1  ;;  %v130_v59 = vrot.slane %v129_v51, 1  ;;  %v141_v60 = vadd.f32 %v140_v48, %v139_v31 }
  0x1f   :  { %1816 = vmatpush3.msra.mxu1 %v330_v9  ;;  %1782 = vmatprep.subr.mxu0 %v313_v14  ;;  %v102_v61 = vrot.slane %v101_v52, 1  ;;  %v137_v62 = vrot.slane %v136_v53, 1  ;;  %v115_v63 = vadd.f32 %v114_v54, %v113_v46  ;;  %v107_v2 = vrot.slane %v106_v55, 2 }
  0x20   :  { %1817 = vmatprep.subr.mxu1 %v345_v15  ;;  %1783 = vmatpush3.msra.mxu0 %v297_v20  ;;  %v150_v3 = vadd.f32 %v149_v57, %v148_v49  ;;  %v96_v4 = vadd.f32 %v95_v58, %v94_v50  ;;  %v131_v5 = vadd.f32 %v130_v59, %v129_v51  ;;  %v142_v6 = vrot.slane %v141_v60, 2  ;;  %v371_v50 = vld [vmem:[%s2820_s3 + $0x258] sm:$0xff]  ;;  %v388_v57 = vld [vmem:[%s2822_s4 + $0x60] sm:$0xff] }
  0x21   :  { %1818 = vmatpush3.msra.mxu1 %v329_v21  ;;  %1784 = vmatprep.subr.mxu0 %v312_v26  ;;  %v103_v7 = vadd.f32 %v102_v61, %v101_v52  ;;  %v138_v8 = vadd.f32 %v137_v62, %v136_v53  ;;  %v116_v9 = vrot.slane %v115_v63, 1  ;;  %v108_v10 = vadd.f32 %v107_v2, %v106_v55  ;;  %v375_v21 = vld [vmem:[%s2820_s3 + $0x278] sm:$0xff]  ;;  %v404_v53 = vld [vmem:[%s2822_s4 + $0xe0] sm:$0xff]  ;;  %v370_v55 = vld [vmem:[%s2820_s3 + $0x250] sm:$0xff] }
  0x22   :  { %1819 = vmatprep.subr.mxu1 %v344_v27  ;;  %1785 = vmatpush3.msra.mxu0 %v296_v32  ;;  %v151_v14 = vrot.slane %v150_v3, 1  ;;  %v472_v15 = vsel %vm471_vm1, %v131_v5, %v96_v4  ;;  %v143_v16 = vadd.f32 %v142_v6, %v141_v60  ;;  %v54_v17 = vrot.slane %v2292_v11, %v2191_v47  ;;  %v403_v61 = vld [vmem:[%s2822_s4 + $0xd8] sm:$0xff]  ;;  %v369_v4 = vld [vmem:[%s2820_s3 + $0x248] sm:$0xff] }
  0x23   :  { %1820 = vmatpush3.msra.mxu1 %v328_v35  ;;  %1932 = vmatprep.subr.mxu0 %v2024_v56  ;;  %v473_v18 = vsel %vm471_vm1, %v138_v8, %v103_v7  ;;  %v117_v19 = vadd.f32 %v116_v9, %v115_v63  ;;  %v109_v20 = vrot.slane %v108_v10, 1  ;;  %v78_v22 = vrot.slane %v2297_v12, %v2191_v47  ;;  %v391_v35 = vld [vmem:[%s2822_s4 + $0x78] sm:$0xff]  ;;  %v402_v7 = vld [vmem:[%s2822_s4 + $0xd0] sm:$0xff] }
  0x24   :  { %1841 = vmatprep.subr.mxu1 %v407_v43  ;;  %546 = vmatprep.mubr.f32.mxu0 %v473_v18  ;;  %v152_v23 = vadd.f32 %v151_v14, %v150_v3  ;;  %v144_v24 = vrot.slane %v143_v16, 1  ;;  %v118_v25 = vsel %vm89_vm0, %v54_v17, 0.0  ;;  %v183_v26 = vcombine.high %v2253_v13, %v2253_v13  ;;  %v390_v43 = vld [vmem:[%s2822_s4 + $0x70] sm:$0xff]  ;;  %v387_v5 = vld [vmem:[%s2822_s4 + $0x58] sm:$0xff]  ;;  %v368_v14 = vld [vmem:[%s2820_s3 + $0x240] sm:$0xff] }
  0x25   :  { %547 = vmatmul.mubr.f32.vlgmr.msra.gmra.mxu0 %v472_v15  ;;  %v110_v27 = vadd.f32 %v109_v20, %v108_v10  ;;  %v119_v29 = vrot.slane %v118_v25, 4  ;;  %v199_v30 = vrot.slane %v2233_v1, %v2191_v47  ;;  %v153_v33 = vsel %vm89_vm0, %v78_v22, 0.0  ;;  %v386_v15 = vld [vmem:[%s2822_s4 + $0x50] sm:$0xff] }
  0x26   :  { %v475_v31 = vsel %vm471_vm1, %v152_v23, %v117_v19  ;;  %v145_v32 = vadd.f32 %v144_v24, %v143_v16  ;;  %1933 = vmatpush3.msra.mxu0 %v375_v21  ;;  %1964 = vmatprep.mubr.msk.f32.mxu0 %vm2025_vm2, %v2024_v56  ;;  %v233_v37 = vsel %vm89_vm0, %v183_v26, 0.0  ;;  %v168_v41 = vcombine.high %v2231_v0, %v2231_v0  ;;  %v405_v0 = vld [vmem:[%s2822_s4 + $0xe8] sm:$0xff]  ;;  %v367_v24 = vld [vmem:[%s2820_s3 + $0x238] sm:$0xff] }
  0x27   :  { %616 = vmatprep.mubr.f32.mxu1 %v475_v31  ;;  %1934 = vmatprep.subr.mxu0 %v2024_v56  ;;  %v207_v36 = vcombine.high %v199_v30, %v199_v30  ;;  %v120_v44 = vadd.f32 %v119_v29, %v118_v25  ;;  %v154_v45 = vrot.slane %v153_v33, 4  ;;  %v226_v46 = vsel %vm89_vm0, %v2253_v13, 0.0  ;;  %v389_v13 = vld [vmem:[%s2822_s4 + $0x68] sm:$0xff] }
  0x28   :  { %v474_v39 = vsel %vm471_vm1, %v145_v32, %v110_v27  ;;  %1935 = vmatpush3.msra.mxu0 %v374_v28  ;;  %v234_v48 = vrot.slane %v233_v37, 4  ;;  %v182_v49 = vrot.slane %v168_v41, %v2191_v47  ;;  %v192_v52 = vcombine.high %v2233_v1, %v2233_v1  ;;  %v401_v19 = vld [vmem:[%s2822_s4 + $0xc8] sm:$0xff] }
  0x29   :  { %617 = vmatmul.mubr.f32.vlgmr.msra.gmra.mxu1 %v474_v39  ;;  %1936 = vmatprep.subr.mxu0 %v2024_v56  ;;  %v268_v51 = vsel %vm89_vm0, %v207_v36, 0.0  ;;  %v227_v54 = vrot.slane %v226_v46, 4  ;;  %v121_v58 = vrot.slane %v120_v44, 2  ;;  %v155_v1 = vadd.f32 %v154_v45, %v153_v33  ;;  %v385_v25 = vld [vmem:[%s2822_s4 + $0x48] sm:$0xff]  ;;  %v384_v36 = vld [vmem:[%s2822_s4 + $0x40] sm:$0xff] }
  0x2a   :  { %1937 = vmatpush3.msra.mxu0 %v373_v34  ;;  %1842 = vmatpush3.msra.mxu1 %v391_v35  ;;  %v261_v59 = vsel %vm89_vm0, %v199_v30, 0.0  ;;  %v184_v60 = vcombine.high %v182_v49, %v182_v49  ;;  %v2371_v62 = vadd.f32 %v234_v48, %v233_v37  ;;  %v269_v63 = vrot.slane %v268_v51, 4  ;;  %v400_v30 = vld [vmem:[%s2822_s4 + $0xc0] sm:$0xff]  ;;  %v366_v35 = vld [vmem:[%s2820_s3 + $0x230] sm:$0xff] }
  0x2b   :  { %1938 = vmatprep.subr.mxu0 %v2024_v56  ;;  %1843 = vmatprep.subr.mxu1 %v406_v40  ;;  %v206_v2 = vrot.slane %v192_v52, %v2191_v47  ;;  %v240_v3 = vsel %vm89_vm0, %v182_v49, 0.0  ;;  %v2386_v8 = vadd.f32 %v227_v54, %v226_v46  ;;  %v262_v9 = vrot.slane %v261_v59, 4 }
  0x2c   :  { %1939 = vmatpush3.msra.mxu0 %v372_v42  ;;  %1844 = vmatpush3.msra.mxu1 %v390_v43  ;;  %v247_v6 = vsel %vm89_vm0, %v184_v60, 0.0  ;;  %v156_v16 = vrot.slane %v155_v1, 2  ;;  %v241_v18 = vrot.slane %v240_v3, 4  ;;  %v2398_v20 = vadd.f32 %v121_v58, %v120_v44  ;;  %v399_v42 = vld [vmem:[%s2822_s4 + $0xb8] sm:$0xff]  ;;  %v382_v58 = vld [vmem:[%s2822_s4 + $0x30] sm:$0xff] }
  0x2d   :  { %1940 = vmatprep.subr.mxu0 %v2024_v56  ;;  %1845 = vmatprep.subr.mxu1 %v405_v0  ;;  %v248_v10 = vrot.slane %v247_v6, 4  ;;  %v208_v17 = vcombine.high %v206_v2, %v206_v2  ;;  %v236_v21 = vrot.slane %v2371_v62, 2  ;;  %v270_v22 = vadd.f32 %v269_v63, %v268_v51  ;;  %v383_v0 = vld [vmem:[%s2822_s4 + $0x38] sm:$0xff]  ;;  %v398_v51 = vld [vmem:[%s2822_s4 + $0xb0] sm:$0xff]  ;;  %v397_v63 = vld [vmem:[%s2822_s4 + $0xa8] sm:$0xff] }
  0x2e   :  { %1941 = vmatpush3.msra.mxu0 %v371_v50  ;;  %1846 = vmatpush3.msra.mxu1 %v389_v13  ;;  %v242_v27 = vadd.f32 %v241_v18, %v240_v3  ;;  %v275_v28 = vsel %vm89_vm0, %v206_v2, 0.0  ;;  %v161_v29 = vmul.f32 %v2292_v11, %v2292_v11  ;;  %v229_v31 = vrot.slane %v2386_v8, 2 }
  0x2f   :  { %1942 = vmatprep.subr.mxu0 %v2024_v56  ;;  %1847 = vmatprep.subr.mxu1 %v404_v53  ;;  %v249_v23 = vadd.f32 %v248_v10, %v247_v6  ;;  %v282_v26 = vsel %vm89_vm0, %v208_v17, 0.0  ;;  %v263_v32 = vadd.f32 %v262_v9, %v261_v59  ;;  %v276_v39 = vrot.slane %v275_v28, 4  ;;  %v381_v6 = vld [vmem:[%s2822_s4 + $0x28] sm:$0xff] }
  0x30   :  { %1943 = vmatpush3.msra.mxu0 %v370_v55  ;;  %1848 = vmatpush3.msra.mxu1 %v388_v57  ;;  %v283_v34 = vrot.slane %v282_v26, 4  ;;  %v243_v37 = vrot.slane %v242_v27, 2  ;;  %v163_v40 = vmul.f32 %v2297_v12, %v2297_v12  ;;  %v191_v41 = vrot.slane %v161_v29, %v2191_v47  ;;  %v365_v12 = vld [vmem:[%s2820_s3 + $0x228] sm:$0xff]  ;;  %v364_v57 = vld [vmem:[%s2820_s3 + $0x220] sm:$0xff] }
  0x31   :  { %1944 = vmatprep.subr.mxu0 %v2024_v56  ;;  %1849 = vmatprep.subr.mxu1 %v403_v61  ;;  %v250_v33 = vrot.slane %v249_v23, 2  ;;  %v123_v43 = vrot.slane %v2398_v20, 1  ;;  %v157_v44 = vadd.f32 %v156_v16, %v155_v1  ;;  %v271_v45 = vrot.slane %v270_v22, 2 }
  0x32   :  { %1945 = vmatpush3.msra.mxu0 %v369_v4  ;;  %1850 = vmatpush3.msra.mxu1 %v387_v5  ;;  %v284_v48 = vadd.f32 %v283_v34, %v282_v26  ;;  %v244_v49 = vadd.f32 %v243_v37, %v242_v27  ;;  %v277_v50 = vadd.f32 %v276_v39, %v275_v28  ;;  %v254_v13 = vsel %vm89_vm0, %v191_v41, 0.0  ;;  %v378_v41 = vld [vmem:[%s2822_s4 + $0x10] sm:$0xff] }
  0x33   :  { %1946 = vmatprep.subr.mxu0 %v2024_v56  ;;  %1851 = vmatprep.subr.mxu1 %v402_v7  ;;  %v251_v46 = vadd.f32 %v250_v33, %v249_v23  ;;  %v264_v52 = vrot.slane %v263_v32, 2  ;;  %v215_v54 = vrot.slane %v163_v40, %v2191_v47  ;;  %v255_v55 = vrot.slane %v254_v13, 4  ;;  %v360_v40 = vld [vmem:[%s2820_s3 + $0x200] sm:$0xff] }
  0x34   :  { %1947 = vmatpush3.msra.mxu0 %v368_v14  ;;  %1852 = vmatpush3.msra.mxu1 %v386_v15  ;;  %v2450_v1 = vadd.f32 %v236_v21, %v2371_v62  ;;  %v285_v59 = vrot.slane %v284_v48, 2  ;;  %v245_v60 = vrot.slane %v244_v49, 1  ;;  %v278_v61 = vrot.slane %v277_v50, 2  ;;  %v363_v62 = vld [vmem:[%s2820_s3 + $0x218] sm:$0xff]  ;;  %v396_v15 = vld [vmem:[%s2822_s4 + $0xa0] sm:$0xff] }
  0x35   :  { %1948 = vmatprep.subr.mxu0 %v2024_v56  ;;  %1853 = vmatprep.subr.mxu1 %v401_v19  ;;  %v252_v53 = vrot.slane %v251_v46, 1  ;;  %v158_v2 = vrot.slane %v157_v44, 1  ;;  %v272_v3 = vadd.f32 %v271_v45, %v270_v22  ;;  %v256_v4 = vadd.f32 %v255_v55, %v254_v13  ;;  %v380_v21 = vld [vmem:[%s2822_s4 + $0x20] sm:$0xff]  ;;  %v438_v55 = vld [vmem:[%s2822_s4 + $0x1f0] sm:$0xff] }
  0x36   :  { %1949 = vmatpush3.msra.mxu0 %v367_v24  ;;  %1854 = vmatpush3.msra.mxu1 %v385_v25  ;;  %v289_v5 = vsel %vm89_vm0, %v215_v54, 0.0  ;;  %v230_v7 = vadd.f32 %v229_v31, %v2386_v8  ;;  %v286_v9 = vadd.f32 %v285_v59, %v284_v48  ;;  %v279_v10 = vadd.f32 %v278_v61, %v277_v50  ;;  %v362_v8 = vld [vmem:[%s2820_s3 + $0x210] sm:$0xff]  ;;  %v379_v31 = vld [vmem:[%s2822_s4 + $0x18] sm:$0xff] }
  0x37   :  { %1950 = vmatprep.subr.mxu0 %v2024_v56  ;;  %1855 = vmatprep.subr.mxu1 %v400_v30  ;;  %v290_v14 = vrot.slane %v289_v5, 4  ;;  %v124_v16 = vadd.f32 %v123_v43, %v2398_v20  ;;  %v265_v17 = vadd.f32 %v264_v52, %v263_v32  ;;  %v253_v18 = vadd.f32 %v252_v53, %v251_v46  ;;  %v395_v20 = vld [vmem:[%s2822_s4 + $0x98] sm:$0xff]  ;;  %v361_v30 = vld [vmem:[%s2820_s3 + $0x208] sm:$0xff]  ;;  %v392_v52 = vld [vmem:[%s2822_s4 + $0x80] sm:$0xff] }
  0x38   :  { %1951 = vmatpush3.msra.mxu0 %v366_v35  ;;  %1856 = vmatpush3.msra.mxu1 %v384_v36  ;;  %v257_v19 = vrot.slane %v256_v4, 2  ;;  %v287_v22 = vrot.slane %v286_v9, 1  ;;  %v246_v23 = vadd.f32 %v245_v60, %v244_v49  ;;  %v280_v24 = vrot.slane %v279_v10, 1  ;;  %v394_v35 = vld [vmem:[%s2822_s4 + $0x90] sm:$0xff]  ;;  %v393_v46 = vld [vmem:[%s2822_s4 + $0x88] sm:$0xff]  ;;  %v439_v48 = vld [vmem:[%s2822_s4 + $0x1f8] sm:$0xff] }
  0x39   :  { %1952 = vmatprep.subr.mxu0 %v2024_v56  ;;  %1857 = vmatprep.subr.mxu1 %v399_v42  ;;  %v291_v25 = vadd.f32 %v290_v14, %v289_v5  ;;  %v159_v26 = vadd.f32 %v158_v2, %v157_v44  ;;  %v238_v27 = vrot.slane %v2450_v1, 1  ;;  %v273_v28 = vrot.slane %v272_v3, 1  ;;  %v377_v49 = vld [vmem:[%s2822_s4 + $0x8] sm:$0xff]  ;;  %v420_v5 = vld [vmem:[%s2822_s4 + $0x160] sm:$0xff]  ;;  %v418_v14 = vld [vmem:[%s2822_s4 + $0x150] sm:$0xff] }
  0x3a   :  { %1953 = vmatpush3.msra.mxu0 %v365_v12  ;;  %1858 = vmatpush3.msra.mxu1 %v383_v0  ;;  %v258_v29 = vadd.f32 %v257_v19, %v256_v4  ;;  %v288_v32 = vadd.f32 %v287_v22, %v286_v9  ;;  %v281_v33 = vadd.f32 %v280_v24, %v279_v10  ;;  %v231_v36 = vrot.slane %v230_v7, 1  ;;  %v437_v60 = vld [vmem:[%s2822_s4 + $0x1e8] sm:$0xff]  ;;  %v436_v4 = vld [vmem:[%s2822_s4 + $0x1e0] sm:$0xff]  ;;  %v434_v10 = vld [vmem:[%s2822_s4 + $0x1d0] sm:$0xff] }
  0x3b   :  { %1954 = vmatprep.subr.mxu0 %v2024_v56  ;;  %1859 = vmatprep.subr.mxu1 %v398_v51  ;;  %v292_v34 = vrot.slane %v291_v25, 2  ;;  %v266_v37 = vrot.slane %v265_v17, 1  ;;  %v476_v45 = vsel %vm471_vm1, %v159_v26, %v124_v16  ;;  %v239_v12 = vadd.f32 %v238_v27, %v2450_v1  ;;  %v423_v51 = vld [vmem:[%s2822_s4 + $0x178] sm:$0xff]  ;;  %v422_v1 = vld [vmem:[%s2822_s4 + $0x170] sm:$0xff]  ;;  %v421_v2 = vld [vmem:[%s2822_s4 + $0x168] sm:$0xff] }
  0x3c   :  { %1955 = vmatpush3.msra.mxu0 %v364_v57  ;;  %1860 = vmatpush3.msra.mxu1 %v382_v58  ;;  %v259_v39 = vrot.slane %v258_v29, 1  ;;  %v2497_v42 = vsel %vm471_vm1, %v288_v32, %v253_v18  ;;  %v2500_v43 = vsel %vm471_vm1, %v281_v33, %v246_v23  ;;  %v274_v0 = vadd.f32 %v273_v28, %v272_v3  ;;  %v376_v57 = vld [vmem:[%s2822_s4] sm:$0xff]  ;;  %v455_v3 = vld [vmem:[%s2822_s4 + $0x278] sm:$0xff]  ;;  %v453_v9 = vld [vmem:[%s2822_s4 + $0x268] sm:$0xff] }
  0x3d   :  { %1956 = vmatprep.subr.mxu0 %v2024_v56  ;;  %1861 = vmatprep.subr.mxu1 %v397_v63  ;;  %v293_v44 = vadd.f32 %v292_v34, %v291_v25  ;;  %v232_v53 = vadd.f32 %v231_v36, %v230_v7  ;;  %v267_v54 = vadd.f32 %v266_v37, %v265_v17  ;;  %v419_v7 = vld [vmem:[%s2822_s4 + $0x158] sm:$0xff]  ;;  %v433_v16 = vld [vmem:[%s2822_s4 + $0x1c8] sm:$0xff]  ;;  %v432_v19 = vld [vmem:[%s2822_s4 + $0x1c0] sm:$0xff] }
  0x3e   :  { %1957 = vmatpush3.msra.mxu0 %v363_v62  ;;  %1862 = vmatpush3.msra.mxu1 %v381_v6  ;;  %v260_v50 = vadd.f32 %v259_v39, %v258_v29  ;;  %v703_v59 = vsel %vm471_vm1, %v274_v0, %v239_v12  ;;  %v454_v62 = vld [vmem:[%s2822_s4 + $0x270] sm:$0xff]  ;;  %v435_v6 = vld [vmem:[%s2822_s4 + $0x1d8] sm:$0xff]  ;;  %v417_v17 = vld [vmem:[%s2822_s4 + $0x148] sm:$0xff] }
  0x3f   :  { %1958 = vmatprep.subr.mxu0 %v2024_v56  ;;  %1863 = vmatprep.subr.mxu1 %v396_v15  ;;  %v294_v13 = vrot.slane %v293_v44, 1  ;;  %v702_v63 = vsel %vm471_vm1, %v267_v54, %v232_v53  ;;  %v452_v15 = vld [vmem:[%s2822_s4 + $0x260] sm:$0xff]  ;;  %v451_v18 = vld [vmem:[%s2822_s4 + $0x258] sm:$0xff]  ;;  %v449_v24 = vld [vmem:[%s2822_s4 + $0x248] sm:$0xff] }
  0x40   :  { %1959 = vmatpush3.msra.mxu0 %v362_v8  ;;  %1864 = vmatpush3.msra.mxu1 %v380_v21  ;;  %v416_v8 = vld [vmem:[%s2822_s4 + $0x140] sm:$0xff]  ;;  %v450_v21 = vld [vmem:[%s2822_s4 + $0x250] sm:$0xff]  ;;  %v431_v22 = vld [vmem:[%s2822_s4 + $0x1b8] sm:$0xff] }
  0x41   :  { %1960 = vmatprep.subr.mxu0 %v2024_v56  ;;  %1865 = vmatprep.subr.mxu1 %v395_v20  ;;  %v295_v58 = vadd.f32 %v294_v13, %v293_v44  ;;  %v415_v23 = vld [vmem:[%s2822_s4 + $0x138] sm:$0xff]  ;;  %v430_v25 = vld [vmem:[%s2822_s4 + $0x1b0] sm:$0xff]  ;;  %v448_v26 = vld [vmem:[%s2822_s4 + $0x240] sm:$0xff] }
  0x42   :  { %1961 = vmatpush3.msra.mxu0 %v361_v30  ;;  %1866 = vmatpush3.msra.mxu1 %v379_v31  ;;  %v414_v20 = vld [vmem:[%s2822_s4 + $0x130] sm:$0xff]  ;;  %v429_v27 = vld [vmem:[%s2822_s4 + $0x1a8] sm:$0xff]  ;;  %v447_v29 = vld [vmem:[%s2822_s4 + $0x238] sm:$0xff] }
  0x43   :  { %1962 = vmatprep.subr.mxu0 %v2024_v56  ;;  %1867 = vmatprep.subr.mxu1 %v394_v35  ;;  %v2534_v61 = vsel %vm471_vm1, %v295_v58, %v260_v50  ;;  %v413_v28 = vld [vmem:[%s2822_s4 + $0x128] sm:$0xff]  ;;  %v428_v30 = vld [vmem:[%s2822_s4 + $0x1a0] sm:$0xff]  ;;  %v446_v32 = vld [vmem:[%s2822_s4 + $0x230] sm:$0xff] }
  0x44   :  { %1963 = vmatpush3.msra.mxu0 %v360_v40  ;;  %1868 = vmatpush3.msra.mxu1 %v378_v41  ;;  %v412_v31 = vld [vmem:[%s2822_s4 + $0x120] sm:$0xff]  ;;  %v427_v33 = vld [vmem:[%s2822_s4 + $0x198] sm:$0xff]  ;;  %v445_v35 = vld [vmem:[%s2822_s4 + $0x228] sm:$0xff] }
  0x45   :  { %1965 = vmatmul.mubr.f32.vlgmr.msra.gmra.mxu0 %v476_v45  ;;  %1869 = vmatprep.subr.mxu1 %v393_v46  ;;  %v411_v34 = vld [vmem:[%s2822_s4 + $0x118] sm:$0xff]  ;;  %v426_v36 = vld [vmem:[%s2822_s4 + $0x190] sm:$0xff]  ;;  %v444_v39 = vld [vmem:[%s2822_s4 + $0x220] sm:$0xff] }
  0x46   :  { %1876 = vmatprep.subr.mxu0 %v439_v48  ;;  %1870 = vmatpush3.msra.mxu1 %v377_v49  ;;  %v410_v37 = vld [vmem:[%s2822_s4 + $0x110] sm:$0xff]  ;;  %v425_v40 = vld [vmem:[%s2822_s4 + $0x188] sm:$0xff]  ;;  %v443_v44 = vld [vmem:[%s2822_s4 + $0x218] sm:$0xff] }
  0x47   :  { %1877 = vmatpush3.msra.mxu0 %v423_v51  ;;  %1871 = vmatprep.subr.mxu1 %v392_v52  ;;  %v409_v41 = vld [vmem:[%s2822_s4 + $0x108] sm:$0xff]  ;;  %v424_v45 = vld [vmem:[%s2822_s4 + $0x180] sm:$0xff]  ;;  %v442_v12 = vld [vmem:[%s2822_s4 + $0x210] sm:$0xff] }
  0x48   :  { %1878 = vmatprep.subr.mxu0 %v438_v55  ;;  %1872 = vmatpush3.msra.mxu1 %v376_v57  ;;  %v408_v46 = vld [vmem:[%s2822_s4 + $0x100] sm:$0xff]  ;;  %v441_v0 = vld [vmem:[%s2822_s4 + $0x208] sm:$0xff]  ;;  %v459_v49 = vld [vmem:[%s2823_s5 + $0x18] sm:$0xff] }
  0x49   :  { %1879 = vmatpush3.msra.mxu0 %v422_v1  ;;  %776 = vmatprep.mubr.f32.mxu1 %v703_v59  ;;  %v440_v48 = vld [vmem:[%s2822_s4 + $0x200] sm:$0xff]  ;;  %v458_v50 = vld [vmem:[%s2823_s5 + $0x10] sm:$0xff] }
  0x4a   :  { %1880 = vmatprep.subr.mxu0 %v437_v60  ;;  %1967 = vmatprep.subr.mxu1 %v2024_v56 }
  0x4b   :  { %777 = vmatmul.mubr.f32.vlgmr.msra.gmra.mxu1 %v702_v63  ;;  %1881 = vmatpush3.msra.mxu0 %v421_v2 }
  0x4c   :  { %1968 = vmatpush3.msra.mxu1 %v455_v3  ;;  %1882 = vmatprep.subr.mxu0 %v436_v4 }
  0x4d   :  { %1969 = vmatprep.subr.mxu1 %v2024_v56  ;;  %1883 = vmatpush3.msra.mxu0 %v420_v5 }
  0x4e   :  { %1970 = vmatpush3.msra.mxu1 %v454_v62  ;;  %1884 = vmatprep.subr.mxu0 %v435_v6 }
  0x4f   :  { %1971 = vmatprep.subr.mxu1 %v2024_v56  ;;  %1885 = vmatpush3.msra.mxu0 %v419_v7 }
  0x50   :  { %1972 = vmatpush3.msra.mxu1 %v453_v9  ;;  %1886 = vmatprep.subr.mxu0 %v434_v10 }
  0x51   :  { %1973 = vmatprep.subr.mxu1 %v2024_v56  ;;  %1887 = vmatpush3.msra.mxu0 %v418_v14 }
  0x52   :  { %1974 = vmatpush3.msra.mxu1 %v452_v15  ;;  %1888 = vmatprep.subr.mxu0 %v433_v16  ;;  %v460_v15 = vld [vmem:[%s2823_s5 + $0x20] sm:$0xff] }
  0x53   :  { %1975 = vmatprep.subr.mxu1 %v2024_v56  ;;  %1889 = vmatpush3.msra.mxu0 %v417_v17  ;;  %v2026_v17 = vmov 1966171168  }
  0x54   :  { %1976 = vmatpush3.msra.mxu1 %v451_v18  ;;  %1890 = vmatprep.subr.mxu0 %v432_v19  ;;  %v1434_v18 = vunpack.c.l.s4 %v2026_v17  ;;  %v2719_v19 = vsub.s32 0, %v2164_v38 }
  0x55   :  { %1977 = vmatprep.subr.mxu1 %v2024_v56  ;;  %1891 = vmatpush3.msra.mxu0 %v416_v8  ;;  %v2722_v8 = vsub.s32 2, %v2164_v38 }
  0x56   :  { %1978 = vmatpush3.msra.mxu1 %v450_v21  ;;  %1892 = vmatprep.subr.mxu0 %v431_v22  ;;  %v2725_v21 = vsub.s32 1, %v2164_v38  ;;  %v2728_v22 = vsub.s32 3, %v2164_v38 }
  0x57   :  { %1979 = vmatprep.subr.mxu1 %v2024_v56  ;;  %1893 = vmatpush3.msra.mxu0 %v415_v23  ;;  %v2734_v23 = vsub.s32 4, %v2164_v38 }
  0x58   :  { %1980 = vmatpush3.msra.mxu1 %v449_v24  ;;  %1894 = vmatprep.subr.mxu0 %v430_v25  ;;  %v1435_v24 = vunpack.c.0.s8 %v1434_v18 }
  0x59   :  { %1981 = vmatprep.subr.mxu1 %v2024_v56  ;;  %1895 = vmatpush3.msra.mxu0 %v414_v20 }
  0x5a   :  { %1982 = vmatpush3.msra.mxu1 %v448_v26  ;;  %1896 = vmatprep.subr.mxu0 %v429_v27 }
  0x5b   :  { %1983 = vmatprep.subr.mxu1 %v2024_v56  ;;  %1897 = vmatpush3.msra.mxu0 %v413_v28 }
  0x5c   :  { %1984 = vmatpush3.msra.mxu1 %v447_v29  ;;  %1898 = vmatprep.subr.mxu0 %v428_v30 }
  0x5d   :  { %1985 = vmatprep.subr.mxu1 %v2024_v56  ;;  %1899 = vmatpush3.msra.mxu0 %v412_v31 }
  0x5e   :  { %1986 = vmatpush3.msra.mxu1 %v446_v32  ;;  %1900 = vmatprep.subr.mxu0 %v427_v33  ;;  %v2742_v32 = vsub.s32 %v1435_v24, %v2164_v38  ;;  %v1389_v38 = vld [vmem:[%s2825_s2] sm:$0x1f] }
  0x5f   :  { %1987 = vmatprep.subr.mxu1 %v2024_v56  ;;  %1901 = vmatpush3.msra.mxu0 %v411_v34 }
  0x60   :  { %1988 = vmatpush3.msra.mxu1 %v445_v35  ;;  %1902 = vmatprep.subr.mxu0 %v426_v36 }
  0x61   :  { %1989 = vmatprep.subr.mxu1 %v2024_v56  ;;  %1903 = vmatpush3.msra.mxu0 %v410_v37 }
  0x62   :  { %1990 = vmatpush3.msra.mxu1 %v444_v39  ;;  %1904 = vmatprep.subr.mxu0 %v425_v40 }
  0x63   :  { %1991 = vmatprep.subr.mxu1 %v2024_v56  ;;  %1905 = vmatpush3.msra.mxu0 %v409_v41 }
  0x64   :  { %1992 = vmatpush3.msra.mxu1 %v443_v44  ;;  %1906 = vmatprep.subr.mxu0 %v424_v45 }
  0x65   :  { %1993 = vmatprep.subr.mxu1 %v2024_v56  ;;  %1907 = vmatpush3.msra.mxu0 %v408_v46 }
  0x66   :  { %846 = vmatprep.mubr.f32.mxu0 %v2497_v42  ;;  %1994 = vmatpush3.msra.mxu1 %v442_v12  ;;  %v457_v42 = vld [vmem:[%s2823_s5 + $0x8] sm:$0xff] }
  0x67   :  { %847 = vmatmul.mubr.f32.vlgmr.msra.gmra.mxu0 %v2500_v43  ;;  %1995 = vmatprep.subr.mxu1 %v2024_v56  ;;  %v456_v43 = vld [vmem:[%s2823_s5] sm:$0xff] }
  0x68   :  { %1996 = vmatpush3.msra.mxu1 %v441_v0  ;;  %1999 = vmatprep.mubr.msk.f32.mxu1 %vm2025_vm2, %v2024_v56 }
  0x69   :  { %1997 = vmatprep.subr.mxu1 %v2024_v56  ;;  %994 = vmatprep.mubr.f32.mxu0 %v2024_v56 }
  0x6a   :  { %1998 = vmatpush3.msra.mxu1 %v440_v48  ;;  %960 = vmatprep.subr.mxu0 %v457_v42 }
  0x6b   :  { %2000 = vmatmul.mubr.f32.vlgmr.msra.gmra.mxu1 %v2534_v61  ;;  %1031 = vmatprep.subr.mxu1 %v459_v49 }
  0x6c   :  { %1065 = vmatprep.mubr.f32.mxu1 %v2024_v56  ;;  %961 = vmatpush1.msra.mxu0 %v456_v43 }
  0x6d   :  { %1032 = vmatpush1.msra.mxu1 %v458_v50  ;;  %2002 = vmatprep.subr.mxu0 %v2024_v56 }
  0x6e   :  { %1175 = vmatprep.subr.mxu1 %v457_v42 }
  0xe5   :  { %v1786_v13 = vpop.f32.mrf.mxu0 }
  0xe7   :  { %v1787_v51 = vpop.f32.mrf.mxu0 }
  0xe8   :  { %v1788_v58 = vadd.f32 %v1787_v51, %v1786_v13 }
  0xe9   :  { %v1821_v54 = vpop.f32.mrf.mxu1 }
  0xeb   :  { %v1822_v55 = vpop.f32.mrf.mxu1 }
  0xec   :  { %v1823_v1 = vadd.f32 %v1822_v55, %v1821_v54  ;;  %v1415_v55 = vrot.slane %v1389_v38, %v2734_v23 }
  0xee   :  { %v619_v61 = vadd.f32 %v1823_v1, %v1788_v58 }
 0x105   :  { %v688_v52 = vpop.f32.mrf.mxu0 }
 0x106   :  { %v689_v2 = vadd.f32 %v688_v52, %v619_v61  ;;  %v1411_v61 = vrot.slane %v1389_v38, %v2728_v22 }
 0x107   :  { %v1966_v53 = vpop.f32.mrf.mxu0 }
 0x108   :  { %v922_v9 = vmul.f32 %v689_v2, %v689_v2  ;;  %v1403_v53 = vrot.slane %v1389_v38, %v2725_v21 }
 0x10b   :  { %v1873_v57 = vpop.f32.mrf.mxu1 }
 0x10d   :  { %v1874_v59 = vpop.f32.mrf.mxu1 }
 0x10e   :  { %v1875_v3 = vadd.f32 %v1874_v59, %v1873_v57 }
 0x127   :  { %v1908_v60 = vpop.f32.mrf.mxu0 }
 0x129   :  { %v1909_v63 = vpop.f32.mrf.mxu0 }
 0x12a   :  { %v1910_v4 = vadd.f32 %v1909_v63, %v1908_v60  ;;  %v1399_v60 = vrot.slane %v1389_v38, %v2719_v19 }
 0x12b   :  { %v918_v5 = vpop.f32.mrf.mxu1 }
 0x12c   :  { %v849_v62 = vadd.f32 %v1910_v4, %v1875_v3 }
 0x12d   :  { %v2001_v6 = vpop.f32.mrf.mxu1 }
 0x12e   :  { %v919_v7 = vadd.f32 %v918_v5, %v849_v62 }
 0x130   :  { %v923_v10 = vsub.f32 %v919_v7, %v922_v9  ;;  %v1407_v7 = vrot.slane %v1389_v38, %v2722_v8 }
 0x132   :  { %v924_v14 = vadd.f32 1e-05, %v923_v10 }
 0x134   :  { %2018 = vrsqrt.f32 %v924_v14 }
 0x141   :  { %v2019_v16 = vpop.eup %2018 }
 0x142   :  { %1748 = vmatmul.mubr.msk.f32.vlgmr.msra.gmra.mxu0 %vm926_vm3, %v2019_v16  ;;  %1749 = vmatmul.mubr.msk.f32.vlgmr.msra.gmra.mxu1 %vm926_vm3, %v2019_v16 }
 0x143   :  { %2003 = vmatpush3.msra.mxu0 %v460_v15  ;;  %2004 = vmatprep.mubr.msk.f32.mxu0 %vm2025_vm2, %v2024_v56 }
 0x144   :  { %1176 = vmatpush1.msra.mxu1 %v456_v43  ;;  %1209 = vmatprep.mubr.f32.mxu1 %v2024_v56 }
 0x145   :  { %1246 = vmatprep.subr.mxu0 %v459_v49  ;;  %2007 = vmatprep.subr.mxu1 %v2024_v56 }
 0x146   :  { %2005 = vmatmul.mubr.msk.f32.vlgmr.msra.gmra.mxu0 %vm926_vm3, %v2019_v16  ;;  %1751 = vmatmul.mubr.msk.f32.vlgmr.msra.gmra.mxu1 %vm926_vm3, %v689_v2 }
 0x147   :  { %1247 = vmatpush1.msra.mxu0 %v458_v50  ;;  %1280 = vmatprep.mubr.f32.mxu0 %v2024_v56 }
 0x148   :  { %2008 = vmatpush3.msra.mxu1 %v460_v15  ;;  %2009 = vmatprep.mubr.msk.f32.mxu1 %vm2025_vm2, %v2024_v56  ;;  %v1357_v56 = vld [vmem:[%s2824_s1] sm:$0x1f] }
 0x149   :  { %v1362_v25 = vrot.slane %v1357_v56, %v2719_v19  ;;  %v1370_v20 = vrot.slane %v1357_v56, %v2722_v8  ;;  %v1366_v26 = vrot.slane %v1357_v56, %v2725_v21  ;;  %v1374_v27 = vrot.slane %v1357_v56, %v2728_v22 }
 0x14a   :  { %1752 = vmatmul.mubr.msk.f32.vlgmr.msra.gmra.mxu0 %vm926_vm3, %v689_v2  ;;  %2010 = vmatmul.mubr.msk.f32.vlgmr.msra.gmra.mxu1 %vm926_vm3, %v689_v2  ;;  %v1378_v30 = vrot.slane %v1357_v56, %v2734_v23 }
 0x202   :  { %v996_v28 = vpop.f32.mrf.mxu0  ;;  %v1067_v29 = vpop.f32.mrf.mxu1 }
 0x203   :  { %v1384_v34 = vmul.f32 %v1362_v25, %v996_v28  ;;  %v1386_v35 = vmul.f32 %v1370_v20, %v1067_v29 }
 0x204   :  { %v998_v31 = vpop.f32.mrf.mxu0  ;;  %v1069_v33 = vpop.f32.mrf.mxu1 }
 0x205   :  { %v1385_v36 = vmul.f32 %v1366_v26, %v998_v31  ;;  %v1387_v37 = vmul.f32 %v1374_v27, %v1069_v33 }
 0x206   :  { %v1138_v39 = vpop.f32.mrf.mxu0  ;;  %v1211_v40 = vpop.f32.mrf.mxu1 }
 0x207   :  { %v1431_v41 = vcombine.low %v1384_v34, %v1385_v36  ;;  %v1432_v44 = vcombine.low %v1386_v35, %v1387_v37  ;;  %v1388_v45 = vmul.f32 %v1378_v30, %v1138_v39  ;;  %v1390_v3 = vmul.f32 %v1384_v34, %v1211_v40 }
 0x208   :  { %v2006_v46 = vpop.f32.mrf.mxu0  ;;  %v1213_v12 = vpop.f32.mrf.mxu1 }
 0x209   :  { %v1439_v0 = vrot.slane %v1431_v41, %v2742_v32  ;;  %v1446_v48 = vrot.slane %v1432_v44, %v2742_v32  ;;  %v1453_v42 = vrot.slane %v1388_v45, %v2742_v32  ;;  %v1391_v52 = vmul.f32 %v1385_v36, %v1213_v12 }
 0x20a   :  { %v1282_v43 = vpop.f32.mrf.mxu0  ;;  %v1353_v49 = vpop.f32.mrf.mxu1  ;;  %v1421_v14 = vsub.f32 %v1399_v60, %v1390_v3 }
 0x20b   :  { %v1454_v50 = vcombine.low %v1439_v0, %v1446_v48  ;;  %v1455_v13 = vcombine.high %v1439_v0, %v1446_v48  ;;  %v1456_v51 = vcombine.high %v1453_v42, %v1453_v42  ;;  %v1394_v54 = vmul.f32 %v1388_v45, %v1353_v49 }
 0x20c   :  { %v1284_v57 = vpop.f32.mrf.mxu0  ;;  %v2011_v58 = vpop.f32.mrf.mxu1  ;;  %v1477_v59 = vrot.slane %v1453_v42, %v2742_v32  ;;  %v1422_v62 = vsub.f32 %v1403_v53, %v1391_v52  ;;  %v1392_v6 = vmul.f32 %v1386_v35, %v1282_v43 }
 0x20d   :  { %v1463_v1 = vrot.slane %v1454_v50, %v2742_v32  ;;  %v1470_v63 = vrot.slane %v1455_v13, %v2742_v32  ;;  %v1484_v2 = vrot.slane %v1456_v51, %v2742_v32  ;;  %v1393_v4 = vmul.f32 %v1387_v37, %v1284_v57 }
 0x20e   :  { %v1425_v9 = vsub.f32 %v1415_v55, %v1394_v54  ;;  %v1588_v24 = vcombine.low %v1421_v14, %v1422_v62  ;;  %v1423_v25 = vsub.f32 %v1407_v7, %v1392_v6 }
 0x20f   :  { %v1485_v5 = vcombine.low %v1463_v1, %v1477_v59  ;;  %v1486_v10 = vcombine.low %v1470_v63, %v1484_v2  ;;  %v1424_v15 = vsub.f32 %v1411_v61, %v1393_v4 }
 0x210   :  { %v1610_v20 = vrot.slane %v1425_v9, %v2742_v32  ;;  %v1596_v35 = vrot.slane %v1588_v24, %v2742_v32 }
 0x211   :  { %v1490_v16 = vrot.slane %v1485_v5, %v2719_v19  ;;  %v1494_v17 = vrot.slane %v1485_v5, %v2725_v21  ;;  %v1498_v18 = vrot.slane %v1485_v5, %v2722_v8  ;;  %v1502_v56 = vrot.slane %v1485_v5, %v2728_v22 }
 0x212   :  { %v1506_v26 = vrot.slane %v1485_v5, %v2734_v23  ;;  %v1510_v27 = vrot.slane %v1486_v10, %v2719_v19  ;;  %v1514_v28 = vrot.slane %v1486_v10, %v2725_v21  ;;  %v1589_v29 = vcombine.low %v1423_v25, %v1424_v15  ;;  %v2020_v5 = vld [vmem:[%s2821_s0 + $0x12] sm:$0x3] }
 0x213   :  { %v1518_v30 = vrot.slane %v1486_v10, %v2722_v8  ;;  %v1522_v31 = vrot.slane %v1486_v10, %v2728_v22  ;;  %v1527_v33 = vcombine.low %v1490_v16, %v1494_v17  ;;  %v1528_v34 = vcombine.low %v1498_v18, %v1502_v56  ;;  %v2022_v18 = vld [vmem:[%s2821_s0 + $0xa] sm:$0xff] }
 0x214   :  { %v1613_v36 = vcombine.high %v1610_v20, %v1610_v20  ;;  %v1603_v37 = vrot.slane %v1589_v29, %v2742_v32  ;;  %v1526_v39 = vrot.slane %v1486_v10, %v2734_v23  ;;  %v1550_v40 = vrot.slane %v1506_v26, %v2191_v47  ;;  %v2021_v10 = vld [vmem:[%s2821_s0] sm:$0xff] }
 0x215   :  { %v1535_v45 = vrot.slane %v1527_v33, %v2191_v47  ;;  %v1542_v46 = vrot.slane %v1528_v34, %v2191_v47  ;;  %v1551_v12 = vcombine.low %v1510_v27, %v1514_v28  ;;  %v1552_v0 = vcombine.low %v1518_v30, %v1522_v31 }
 0x216   :  { %v1611_v41 = vcombine.low %v1596_v35, %v1603_v37  ;;  %v1612_v44 = vcombine.high %v1596_v35, %v1603_v37  ;;  %v1634_v48 = vrot.slane %v1610_v20, %v2742_v32  ;;  %v1641_v42 = vrot.slane %v1613_v36, %v2742_v32 }
 0x217   :  { %v1574_v49 = vrot.slane %v1526_v39, %v2191_v47  ;;  %v1543_v51 = vcombine.low %v1535_v45, %v1542_v46  ;;  %v1559_v52 = vrot.slane %v1551_v12, %v2191_v47  ;;  %v1566_v53 = vrot.slane %v1552_v0, %v2191_v47 }
 0x218   :  { %v1620_v38 = vrot.slane %v1611_v41, %v2742_v32  ;;  %v1627_v43 = vrot.slane %v1612_v44, %v2742_v32  ;;  %v1580_v54 = vmul.f32 %v1550_v40, %v2292_v11 }
 0x219   :  { %v1567_v4 = vcombine.low %v1559_v52, %v1566_v53  ;;  %v1582_v62 = vmul.f32 %v2020_v5, %v1574_v49  ;;  %v1579_v14 = vmul.f32 %v2021_v10, %v1543_v51 }
 0x21a   :  { %v1642_v50 = vcombine.low %v1620_v38, %v1634_v48  ;;  %v1643_v13 = vcombine.low %v1627_v43, %v1641_v42 }
 0x21b   :  { %v1581_v56 = vmul.f32 %v2022_v18, %v1567_v4 }
 0x21c   :  { %v1647_v55 = vrot.slane %v1642_v50, %v2719_v19  ;;  %v1651_v57 = vrot.slane %v1642_v50, %v2725_v21  ;;  %v1655_v58 = vrot.slane %v1642_v50, %v2722_v8  ;;  %v1659_v1 = vrot.slane %v1642_v50, %v2728_v22 }
 0x21d   :  { %v1663_v32 = vrot.slane %v1642_v50, %v2734_v23  ;;  %v1667_v59 = vrot.slane %v1643_v13, %v2719_v19  ;;  %v1671_v60 = vrot.slane %v1643_v13, %v2725_v21  ;;  %v1675_v61 = vrot.slane %v1643_v13, %v2722_v8 }
 0x21e   :  { %v1679_v63 = vrot.slane %v1643_v13, %v2728_v22  ;;  %v1683_v11 = vrot.slane %v1643_v13, %v2734_v23  ;;  %v1684_v2 = vcombine.low %v1647_v55, %v1651_v57  ;;  %v1685_v3 = vcombine.low %v1655_v58, %v1659_v1 }
 0x21f   :  { %v1707_v6 = vrot.slane %v1663_v32, %v2191_v47  ;;  %v1708_v7 = vcombine.low %v1667_v59, %v1671_v60 }
 0x220   :  { %v1692_v19 = vrot.slane %v1684_v2, %v2191_v47  ;;  %v1699_v21 = vrot.slane %v1685_v3, %v2191_v47  ;;  %v1709_v8 = vcombine.low %v1675_v61, %v1679_v63  ;;  %v1731_v22 = vrot.slane %v1683_v11, %v2191_v47 }
 0x221   :  { %v1716_v23 = vrot.slane %v1708_v7, %v2191_v47  ;;  %v1737_v9 = vadd.f32 %v1707_v6, %v1580_v54 }
 0x222   :  { %v1700_v15 = vcombine.low %v1692_v19, %v1699_v21  ;;  %v1723_v16 = vrot.slane %v1709_v8, %v2191_v47  ;;  %v1739_v17 = vadd.f32 %v1731_v22, %v1582_v62 }
 0x223   :  { %1741 = vst [vmem:[%s2826_s6 + $0x8] sm:$0x3] %v1737_v9 }
 0x224   :  { %v1724_v24 = vcombine.low %v1716_v23, %v1723_v16  ;;  %v1736_v25 = vadd.f32 %v1700_v15, %v1579_v14  ;;  %1743 = vst [vmem:[%s2826_s6 + $0x12] sm:$0x3] %v1739_v17 }
 0x226   :  { %v1738_v20 = vadd.f32 %v1724_v24, %v1581_v56  ;;  %1740 = vst [vmem:[%s2826_s6] sm:$0xff] %v1736_v25 }
 0x228   :  { %1742 = vst [vmem:[%s2826_s6 + $0xa] sm:$0xff] %v1738_v20 }

</bundles_post_ra>
